<compile_context>
chip_gen: v7x
topology: tpu7x:2x2x1
jax: 0.10.0
libtpu: 0.0.40
codegen_flags: <defaults>
</compile_context>

<pallas_src>
import jax
import jax.numpy as jnp
from jax.experimental import pallas as pl
from jax.experimental.pallas import tpu as pltpu

LATENT_DIM = 20
NUM_CLASSES = 10
IMG_DIM = 28 * 28          # 784
ENC_IN = IMG_DIM * 2       # 1568
HIDDEN = 400
HIDDEN_P = 512             # HIDDEN zero-padded to a lane-dense multiple of 128


def _round_up(x, m):
    return ((x + m - 1) // m) * m


def _tpu_tile_config():
    """(max batch tile rows, vmem limit bytes) -- generation aware."""
    try:
        vmem_cap = pltpu.get_tpu_info().vmem_capacity_bytes
    except Exception:
        vmem_cap = 64 << 20          # conservative (v7x-sized) fallback
    if vmem_cap >= (96 << 20):       # v5e / v6e: 128 MiB physical VMEM
        return 1024, 64 << 20
    return 256, 24 << 20             # v7x: 64 MiB physical VMEM


MAX_BATCH_TILE, VMEM_LIMIT_BYTES = _tpu_tile_config()


def cvae_kernel(
    x_ref,      # (TB, 784)      bf16  flattened image
    y_ref,      # (TB, 1)        int32 class labels
    eps_ref,    # (TB, 20)       f32   reparameterization noise
    wex_ref,    # (784, 512)     bf16  encoder weight, image part (HIDDEN padded)
    be_ref,     # (1, 512)       f32
    tbl_ref,    # (10, 1024)     f32   [label_emb @ W_enc_y | W_d1_y]  per class
    wh_ref,     # (512, 40)      f32   fused [W_mu | W_logvar]
    bh_ref,     # (1, 40)        f32
    wd1z_ref,   # (20, 512)      f32   decoder layer-1 weight, z part
    bd1_ref,    # (1, 512)       f32
    wd2_ref,    # (512, 784)     bf16  decoder layer-2 weight
    bd2_ref,    # (1, 784)       f32
    xr_ref,     # out (TB, 784)  f32
    heads_ref,  # out (TB, 40)   f32   [mu | logvar]
):
    f32 = jnp.float32
    bf16 = jnp.bfloat16
    tb = x_ref.shape[0]

    # ----- label path: one-hot built in-register, one tiny K=10 MXU dot -----
    classes = jax.lax.broadcasted_iota(jnp.int32, (tb, NUM_CLASSES), 1)
    onehot = jnp.where(classes == y_ref[...], 1.0, 0.0).astype(f32)      # (TB, 10)
    label_terms = jnp.dot(onehot, tbl_ref[...],
                          preferred_element_type=f32)                    # (TB, 1024)

    # ----- encoder: h = relu(x @ We_x + T[y] + be) -----
    h = jnp.dot(x_ref[...], wex_ref[...], preferred_element_type=f32)
    h = jnp.maximum(h + label_terms[:, :HIDDEN_P] + be_ref[...], 0.0)

    # ----- fused mu / logvar heads -----
    heads = jnp.dot(h, wh_ref[...], preferred_element_type=f32) + bh_ref[...]
    mu = heads[:, :LATENT_DIM]
    lv = heads[:, LATENT_DIM:]

    # ----- reparameterize: z = mu + eps * exp(0.5 * logvar) -----
    z = mu + eps_ref[...] * jnp.exp(0.5 * lv)

    # ----- decoder layer 1: relu(z @ Wd1_z + Wd1_y[y] + bd1) -----
    h2 = jnp.dot(z, wd1z_ref[...], preferred_element_type=f32)
    h2 = jnp.maximum(h2 + label_terms[:, HIDDEN_P:] + bd1_ref[...], 0.0)

    # ----- decoder layer 2: sigmoid(h2 @ Wd2 + bd2), EUP-friendly sigmoid -----
    logits = jnp.dot(h2.astype(bf16), wd2_ref[...], preferred_element_type=f32)
    logits = logits + bd2_ref[...]
    xr_ref[...] = pl.reciprocal(1.0 + jnp.exp(-logits), approx=True)
    heads_ref[...] = heads


def init_params(key):
    """Deterministic synthetic parameters; shapes match the torch module."""
    ks = jax.random.split(key, 11)

    def lin(kw, kb, fan_in, fan_out):
        # torch.nn.Linear default init: U(-1/sqrt(fan_in), 1/sqrt(fan_in))
        bound = 1.0 / jnp.sqrt(jnp.float32(fan_in))
        w = jax.random.uniform(kw, (fan_in, fan_out), jnp.float32, -bound, bound)
        b = jax.random.uniform(kb, (1, fan_out), jnp.float32, -bound, bound)
        return w, b

    params = {}
    # nn.Embedding(num_classes, 784): default init N(0, 1)
    params["label_emb"] = jax.random.normal(ks[0], (NUM_CLASSES, IMG_DIM), jnp.float32)
    params["w_enc"], params["b_enc"] = lin(ks[1], ks[2], ENC_IN, HIDDEN)
    params["w_mu"], params["b_mu"] = lin(ks[3], ks[4], HIDDEN, LATENT_DIM)
    params["w_lv"], params["b_lv"] = lin(ks[5], ks[6], HIDDEN, LATENT_DIM)
    params["w_d1"], params["b_d1"] = lin(ks[7], ks[8], LATENT_DIM + NUM_CLASSES, HIDDEN)
    params["w_d2"], params["b_d2"] = lin(ks[9], ks[10], HIDDEN, IMG_DIM)
    return params


def prepare_params(p):
    """One-time conversion of torch-layout params into the kernel-ready form.

    HIDDEN is zero-padded 400 -> 512 (exact: padded hidden units are relu(0)=0
    and hit zero rows in the following weights)."""
    pad_cols = ((0, 0), (0, HIDDEN_P - HIDDEN))
    pad_rows = ((0, HIDDEN_P - HIDDEN), (0, 0))

    w_enc_x = p["w_enc"][:IMG_DIM]          # (784, 400)
    w_enc_y = p["w_enc"][IMG_DIM:]          # (784, 400) -> folded with the embedding
    t_enc_y = jnp.dot(p["label_emb"], w_enc_y,
                      precision=jax.lax.Precision.HIGHEST)               # (10, 400)
    w_d1y = p["w_d1"][LATENT_DIM:]          # (10, 400)   one-hot matmul rows

    return {
        "w_enc_x": jnp.pad(w_enc_x, pad_cols).astype(jnp.bfloat16),      # (784, 512)
        "b_enc": jnp.pad(p["b_enc"], pad_cols),                          # (1, 512)
        # per-class additive terms: [:, :512] encoder, [:, 512:] decoder layer 1
        "label_tbl": jnp.concatenate(
            [jnp.pad(t_enc_y, pad_cols), jnp.pad(w_d1y, pad_cols)], axis=1),  # (10,1024)
        "w_heads": jnp.pad(jnp.concatenate([p["w_mu"], p["w_lv"]], axis=1),
                           pad_rows),                                    # (512, 40)
        "b_heads": jnp.concatenate([p["b_mu"], p["b_lv"]], axis=1),      # (1, 40)
        "w_d1z": jnp.pad(p["w_d1"][:LATENT_DIM], pad_cols),              # (20, 512)
        "b_d1": jnp.pad(p["b_d1"], pad_cols),                            # (1, 512)
        "w_d2": jnp.pad(p["w_d2"], pad_rows).astype(jnp.bfloat16),       # (512, 784)
        "b_d2": p["b_d2"],                                               # (1, 784)
    }


@jax.jit
def cvae_forward(prep, x, y, eps):
    """x: (B, 1, 28, 28) f32 NCHW; y: (B,) int labels; eps: (B, 20) f32 noise."""
    B = x.shape[0]
    x_flat = x.reshape(B, IMG_DIM).astype(jnp.bfloat16)        # x.view(-1, 784)
    y_col = y.reshape(B, 1).astype(jnp.int32)

    # Batch tiling: always >= 2 tiles (so "parallel" shards across v7x's two
    # TensorCores), capped by the generation-aware MAX_BATCH_TILE.
    TB = min(MAX_BATCH_TILE, max(8, _round_up(-(-B // 2), 8)))
    n_tiles = max(2, -(-B // TB))
    Bp = n_tiles * TB
    if Bp != B:
        pad = ((0, Bp - B), (0, 0))
        x_flat = jnp.pad(x_flat, pad)
        y_col = jnp.pad(y_col, pad)          # padded rows -> class 0, sliced off later
        eps = jnp.pad(eps, pad)

    def batch_spec(cols):
        return pl.BlockSpec((TB, cols), lambda i: (i, 0))

    def resident_spec(rows, cols):
        # constant index_map + single buffering: the weight block stays resident
        # in VMEM across all batch tiles, no second (double-buffer) copy.
        return pl.BlockSpec((rows, cols), lambda i: (0, 0),
                            pipeline_mode=pl.Buffered(1))

    out_shapes = (
        jax.ShapeDtypeStruct((Bp, IMG_DIM), jnp.float32),
        jax.ShapeDtypeStruct((Bp, 2 * LATENT_DIM), jnp.float32),
    )

    xr, heads = pl.pallas_call(
        cvae_kernel,
        out_shape=out_shapes,
        grid=(n_tiles,),
        in_specs=[
            batch_spec(IMG_DIM),                         # x_flat
            batch_spec(1),                               # y (labels)
            batch_spec(LATENT_DIM),                      # eps
            resident_spec(IMG_DIM, HIDDEN_P),            # w_enc_x
            resident_spec(1, HIDDEN_P),                  # b_enc
            resident_spec(NUM_CLASSES, 2 * HIDDEN_P),    # label_tbl
            resident_spec(HIDDEN_P, 2 * LATENT_DIM),     # w_heads
            resident_spec(1, 2 * LATENT_DIM),            # b_heads
            resident_spec(LATENT_DIM, HIDDEN_P),         # w_d1z
            resident_spec(1, HIDDEN_P),                  # b_d1
            resident_spec(HIDDEN_P, IMG_DIM),            # w_d2
            resident_spec(1, IMG_DIM),                   # b_d2
        ],
        out_specs=(
            batch_spec(IMG_DIM),                         # x_reconst
            batch_spec(2 * LATENT_DIM),                  # [mu | logvar]
        ),
        compiler_params=pltpu.CompilerParams(
            dimension_semantics=("parallel",),           # v7x: batch tiles over 2 TCs
            vmem_limit_bytes=VMEM_LIMIT_BYTES,
        ),
    )(
        x_flat, y_col, eps,
        prep["w_enc_x"], prep["b_enc"], prep["label_tbl"],
        prep["w_heads"], prep["b_heads"],
        prep["w_d1z"], prep["b_d1"],
        prep["w_d2"], prep["b_d2"],
    )
    heads = heads[:B]
    return xr[:B], heads[:, :LATENT_DIM], heads[:, LATENT_DIM:]


def reference_forward(prep, x, y, eps):
    """Pure-JAX reference mirroring the kernel math (same prepared params / casts)."""
    f32 = jnp.float32
    B = x.shape[0]
    x_bf = x.reshape(B, IMG_DIM).astype(jnp.bfloat16)
    onehot = jax.nn.one_hot(y, NUM_CLASSES, dtype=f32)
    label_terms = jnp.dot(onehot, prep["label_tbl"])
    h = jnp.maximum(
        jnp.dot(x_bf, prep["w_enc_x"], preferred_element_type=f32)
        + label_terms[:, :HIDDEN_P] + prep["b_enc"], 0.0)
    heads = jnp.dot(h, prep["w_heads"], preferred_element_type=f32) + prep["b_heads"]
    mu = heads[:, :LATENT_DIM]
    lv = heads[:, LATENT_DIM:]
    z = mu + eps * jnp.exp(0.5 * lv)
    h2 = jnp.maximum(
        jnp.dot(z, prep["w_d1z"], preferred_element_type=f32)
        + label_terms[:, HIDDEN_P:] + prep["b_d1"], 0.0)
    logits = jnp.dot(h2.astype(jnp.bfloat16), prep["w_d2"],
                     preferred_element_type=f32) + prep["b_d2"]
    return jax.nn.sigmoid(logits), mu, lv


if __name__ == "__main__":
    key = jax.random.PRNGKey(0)
    k_param, k_x, k_y, k_eps = jax.random.split(key, 4)

    B = 4
    params = init_params(k_param)
    prep = prepare_params(params)

    x = jax.random.uniform(k_x, (B, 1, 28, 28), jnp.float32)          # NCHW input
    y = jax.random.randint(k_y, (B,), 0, NUM_CLASSES, dtype=jnp.int32)  # class labels
    # torch uses randn_like inside reparameterize; the noise is generated outside
    # the kernel and passed in (same semantics, deterministic).
    eps = jax.random.normal(k_eps, (B, LATENT_DIM), jnp.float32)

    x_reconst, mu, logvar = cvae_forward(prep, x, y, eps)
    jax.block_until_ready((x_reconst, mu, logvar))

    # correctness check against a pure-JAX reference using identical params/casts
    xr_ref, mu_ref, lv_ref = reference_forward(prep, x, y, eps)
    assert x_reconst.shape == (B, IMG_DIM)
    assert mu.shape == (B, LATENT_DIM) and logvar.shape == (B, LATENT_DIM)
    assert jnp.allclose(x_reconst, xr_ref, atol=1e-2, rtol=1e-2)
    assert jnp.allclose(mu, mu_ref, atol=1e-2, rtol=1e-2)
    assert jnp.allclose(logvar, lv_ref, atol=1e-2, rtol=1e-2)

    print("KERNEL_OK")
</pallas_src>

<mosaic_0001>
module attributes {stable_mosaic.version = 11 : i64} {
  func.func @cvae_kernel(%arg0: i32, %arg1: memref<8x784xbf16, #tpu.memory_space<vmem>>, %arg2: memref<8x1xi32, #tpu.memory_space<vmem>>, %arg3: memref<8x20xf32, #tpu.memory_space<vmem>>, %arg4: memref<784x512xbf16, #tpu.memory_space<vmem>>, %arg5: memref<1x512xf32, #tpu.memory_space<vmem>>, %arg6: memref<10x1024xf32, #tpu.memory_space<vmem>>, %arg7: memref<512x40xf32, #tpu.memory_space<vmem>>, %arg8: memref<1x40xf32, #tpu.memory_space<vmem>>, %arg9: memref<20x512xf32, #tpu.memory_space<vmem>>, %arg10: memref<1x512xf32, #tpu.memory_space<vmem>>, %arg11: memref<512x784xbf16, #tpu.memory_space<vmem>>, %arg12: memref<1x784xf32, #tpu.memory_space<vmem>>, %arg13: memref<8x784xf32, #tpu.memory_space<vmem>>, %arg14: memref<8x40xf32, #tpu.memory_space<vmem>>) attributes {dimension_semantics = [#tpu.dimension_semantics<parallel>], iteration_bounds = array<i64: 2>, scalar_prefetch = 0 : i64, scratch_operands = 0 : i64, tpu.core_type = #tpu.core_type<tc>, window_params = [{transform_indices = @transform_0, window_bounds = array<i64: 8, 784>}, {transform_indices = @transform_1, window_bounds = array<i64: 8, 1>}, {transform_indices = @transform_2, window_bounds = array<i64: 8, 20>}, {pipeline_mode = #tpu.pipeline_mode<synchronous>, transform_indices = @transform_3, window_bounds = array<i64: 784, 512>}, {pipeline_mode = #tpu.pipeline_mode<synchronous>, transform_indices = @transform_4, window_bounds = array<i64: 1, 512>}, {pipeline_mode = #tpu.pipeline_mode<synchronous>, transform_indices = @transform_5, window_bounds = array<i64: 10, 1024>}, {pipeline_mode = #tpu.pipeline_mode<synchronous>, transform_indices = @transform_6, window_bounds = array<i64: 512, 40>}, {pipeline_mode = #tpu.pipeline_mode<synchronous>, transform_indices = @transform_7, window_bounds = array<i64: 1, 40>}, {pipeline_mode = #tpu.pipeline_mode<synchronous>, transform_indices = @transform_8, window_bounds = array<i64: 20, 512>}, {pipeline_mode = #tpu.pipeline_mode<synchronous>, transform_indices = @transform_9, window_bounds = array<i64: 1, 512>}, {pipeline_mode = #tpu.pipeline_mode<synchronous>, transform_indices = @transform_10, window_bounds = array<i64: 512, 784>}, {pipeline_mode = #tpu.pipeline_mode<synchronous>, transform_indices = @transform_11, window_bounds = array<i64: 1, 784>}, {transform_indices = @transform_12, window_bounds = array<i64: 8, 784>}, {transform_indices = @transform_13, window_bounds = array<i64: 8, 40>}]} {
    %0 = tpu.iota {dimensions = array<i32: 1>} : vector<8x10xi32>
    %c0 = arith.constant 0 : index
    %c0_0 = arith.constant 0 : index
    %1 = vector.load %arg2[%c0, %c0_0] : memref<8x1xi32, #tpu.memory_space<vmem>>, vector<8x1xi32>
    %2 = vector.broadcast %1 : vector<8x1xi32> to vector<8x10xi32>
    %3 = arith.cmpi eq, %0, %2 : vector<8x10xi32>
    %cst = arith.constant 1.000000e+00 : f32
    %cst_1 = arith.constant 0.000000e+00 : f32
    %4 = vector.broadcast %cst : f32 to vector<8x10xf32>
    %5 = vector.broadcast %cst_1 : f32 to vector<8x10xf32>
    %6 = arith.select %3, %4, %5 : vector<8x10xi1>, vector<8x10xf32>
    %c0_2 = arith.constant 0 : index
    %c0_3 = arith.constant 0 : index
    %7 = vector.load %arg6[%c0_2, %c0_3] : memref<10x1024xf32, #tpu.memory_space<vmem>>, vector<10x1024xf32>
    %cst_4 = arith.constant dense<0.000000e+00> : vector<8x1024xf32>
    %8 = tpu.matmul %6, %7, %cst_4 {dimension_numbers = #tpu.dot_dimension_numbers<[1], [0], [0], [1], [0, 0, 1, 1], [], []>} : vector<8x10xf32>, vector<10x1024xf32>, vector<8x1024xf32> -> vector<8x1024xf32>
    %c0_5 = arith.constant 0 : index
    %c0_6 = arith.constant 0 : index
    %9 = vector.load %arg1[%c0_5, %c0_6] : memref<8x784xbf16, #tpu.memory_space<vmem>>, vector<8x784xbf16>
    %c0_7 = arith.constant 0 : index
    %c0_8 = arith.constant 0 : index
    %10 = vector.load %arg4[%c0_7, %c0_8] : memref<784x512xbf16, #tpu.memory_space<vmem>>, vector<784x512xbf16>
    %cst_9 = arith.constant dense<0.000000e+00> : vector<8x512xf32>
    %11 = tpu.matmul %9, %10, %cst_9 {dimension_numbers = #tpu.dot_dimension_numbers<[1], [0], [0], [1], [0, 0, 1, 1], [], []>} : vector<8x784xbf16>, vector<784x512xbf16>, vector<8x512xf32> -> vector<8x512xf32>
    %12 = vector.extract_strided_slice %8 {offsets = [0, 0], sizes = [8, 512], strides = [1, 1]} : vector<8x1024xf32> to vector<8x512xf32>
    %13 = arith.addf %11, %12 : vector<8x512xf32>
    %c0_10 = arith.constant 0 : index
    %c0_11 = arith.constant 0 : index
    %14 = vector.load %arg5[%c0_10, %c0_11] : memref<1x512xf32, #tpu.memory_space<vmem>>, vector<1x512xf32>
    %15 = vector.broadcast %14 : vector<1x512xf32> to vector<8x512xf32>
    %16 = arith.addf %13, %15 : vector<8x512xf32>
    %cst_12 = arith.constant 0.000000e+00 : f32
    %17 = vector.broadcast %cst_12 : f32 to vector<8x512xf32>
    %18 = arith.maximumf %16, %17 : vector<8x512xf32>
    %c0_13 = arith.constant 0 : index
    %c0_14 = arith.constant 0 : index
    %19 = vector.load %arg7[%c0_13, %c0_14] : memref<512x40xf32, #tpu.memory_space<vmem>>, vector<512x40xf32>
    %cst_15 = arith.constant dense<0.000000e+00> : vector<8x40xf32>
    %20 = tpu.matmul %18, %19, %cst_15 {dimension_numbers = #tpu.dot_dimension_numbers<[1], [0], [0], [1], [0, 0, 1, 1], [], []>} : vector<8x512xf32>, vector<512x40xf32>, vector<8x40xf32> -> vector<8x40xf32>
    %c0_16 = arith.constant 0 : index
    %c0_17 = arith.constant 0 : index
    %21 = vector.load %arg8[%c0_16, %c0_17] : memref<1x40xf32, #tpu.memory_space<vmem>>, vector<1x40xf32>
    %22 = vector.broadcast %21 : vector<1x40xf32> to vector<8x40xf32>
    %23 = arith.addf %20, %22 : vector<8x40xf32>
    %24 = vector.extract_strided_slice %23 {offsets = [0, 0], sizes = [8, 20], strides = [1, 1]} : vector<8x40xf32> to vector<8x20xf32>
    %25 = vector.extract_strided_slice %23 {offsets = [0, 20], sizes = [8, 20], strides = [1, 1]} : vector<8x40xf32> to vector<8x20xf32>
    %c0_18 = arith.constant 0 : index
    %c0_19 = arith.constant 0 : index
    %26 = vector.load %arg3[%c0_18, %c0_19] : memref<8x20xf32, #tpu.memory_space<vmem>>, vector<8x20xf32>
    %cst_20 = arith.constant 5.000000e-01 : f32
    %27 = vector.broadcast %cst_20 : f32 to vector<8x20xf32>
    %28 = arith.mulf %27, %25 : vector<8x20xf32>
    %29 = math.exp %28 : vector<8x20xf32>
    %30 = arith.mulf %26, %29 : vector<8x20xf32>
    %31 = arith.addf %24, %30 : vector<8x20xf32>
    %c0_21 = arith.constant 0 : index
    %c0_22 = arith.constant 0 : index
    %32 = vector.load %arg9[%c0_21, %c0_22] : memref<20x512xf32, #tpu.memory_space<vmem>>, vector<20x512xf32>
    %cst_23 = arith.constant dense<0.000000e+00> : vector<8x512xf32>
    %33 = tpu.matmul %31, %32, %cst_23 {dimension_numbers = #tpu.dot_dimension_numbers<[1], [0], [0], [1], [0, 0, 1, 1], [], []>} : vector<8x20xf32>, vector<20x512xf32>, vector<8x512xf32> -> vector<8x512xf32>
    %34 = vector.extract_strided_slice %8 {offsets = [0, 512], sizes = [8, 512], strides = [1, 1]} : vector<8x1024xf32> to vector<8x512xf32>
    %35 = arith.addf %33, %34 : vector<8x512xf32>
    %c0_24 = arith.constant 0 : index
    %c0_25 = arith.constant 0 : index
    %36 = vector.load %arg10[%c0_24, %c0_25] : memref<1x512xf32, #tpu.memory_space<vmem>>, vector<1x512xf32>
    %37 = vector.broadcast %36 : vector<1x512xf32> to vector<8x512xf32>
    %38 = arith.addf %35, %37 : vector<8x512xf32>
    %cst_26 = arith.constant 0.000000e+00 : f32
    %39 = vector.broadcast %cst_26 : f32 to vector<8x512xf32>
    %40 = arith.maximumf %38, %39 : vector<8x512xf32>
    %41 = arith.truncf %40 : vector<8x512xf32> to vector<8x512xbf16>
    %c0_27 = arith.constant 0 : index
    %c0_28 = arith.constant 0 : index
    %42 = vector.load %arg11[%c0_27, %c0_28] : memref<512x784xbf16, #tpu.memory_space<vmem>>, vector<512x784xbf16>
    %cst_29 = arith.constant dense<0.000000e+00> : vector<8x784xf32>
    %43 = tpu.matmul %41, %42, %cst_29 {dimension_numbers = #tpu.dot_dimension_numbers<[1], [0], [0], [1], [0, 0, 1, 1], [], []>} : vector<8x512xbf16>, vector<512x784xbf16>, vector<8x784xf32> -> vector<8x784xf32>
    %c0_30 = arith.constant 0 : index
    %c0_31 = arith.constant 0 : index
    %44 = vector.load %arg12[%c0_30, %c0_31] : memref<1x784xf32, #tpu.memory_space<vmem>>, vector<1x784xf32>
    %45 = vector.broadcast %44 : vector<1x784xf32> to vector<8x784xf32>
    %46 = arith.addf %43, %45 : vector<8x784xf32>
    %cst_32 = arith.constant 0.000000e+00 : f32
    %47 = vector.broadcast %cst_32 : f32 to vector<8x784xf32>
    %48 = arith.subf %47, %46 : vector<8x784xf32>
    %49 = math.exp %48 : vector<8x784xf32>
    %cst_33 = arith.constant 1.000000e+00 : f32
    %50 = vector.broadcast %cst_33 : f32 to vector<8x784xf32>
    %51 = arith.addf %50, %49 : vector<8x784xf32>
    %52 = tpu.reciprocal %51 {approx = true} : vector<8x784xf32> -> vector<8x784xf32>
    %c0_34 = arith.constant 0 : index
    %c0_35 = arith.constant 0 : index
    %53 = vector.load %arg13[%c0_34, %c0_35] : memref<8x784xf32, #tpu.memory_space<vmem>>, vector<8x784xf32>
    tpu.vector_store %arg13[%c0_34, %c0_35], %52 {strides = array<i32>} : memref<8x784xf32, #tpu.memory_space<vmem>>, vector<8x784xf32>,
    %c0_36 = arith.constant 0 : index
    %c0_37 = arith.constant 0 : index
    %54 = vector.load %arg14[%c0_36, %c0_37] : memref<8x40xf32, #tpu.memory_space<vmem>>, vector<8x40xf32>
    tpu.vector_store %arg14[%c0_36, %c0_37], %23 {strides = array<i32>} : memref<8x40xf32, #tpu.memory_space<vmem>>, vector<8x40xf32>,
    return
  }
  func.func @transform_0(%arg0: i32) -> (i32, i32) {
    %c0_i32 = arith.constant 0 : i32
    %c0_i32_0 = arith.constant 0 : i32
    return %arg0, %c0_i32 : i32, i32
  }
  func.func @transform_1(%arg0: i32) -> (i32, i32) {
    %c0_i32 = arith.constant 0 : i32
    %c0_i32_0 = arith.constant 0 : i32
    return %arg0, %c0_i32 : i32, i32
  }
  func.func @transform_2(%arg0: i32) -> (i32, i32) {
    %c0_i32 = arith.constant 0 : i32
    %c0_i32_0 = arith.constant 0 : i32
    return %arg0, %c0_i32 : i32, i32
  }
  func.func @transform_3(%arg0: i32) -> (i32, i32) {
    %c0_i32 = arith.constant 0 : i32
    %c0_i32_0 = arith.constant 0 : i32
    %c0_i32_1 = arith.constant 0 : i32
    return %c0_i32, %c0_i32_0 : i32, i32
  }
  func.func @transform_4(%arg0: i32) -> (i32, i32) {
    %c0_i32 = arith.constant 0 : i32
    %c0_i32_0 = arith.constant 0 : i32
    %c0_i32_1 = arith.constant 0 : i32
    return %c0_i32, %c0_i32_0 : i32, i32
  }
  func.func @transform_5(%arg0: i32) -> (i32, i32) {
    %c0_i32 = arith.constant 0 : i32
    %c0_i32_0 = arith.constant 0 : i32
    %c0_i32_1 = arith.constant 0 : i32
    return %c0_i32, %c0_i32_0 : i32, i32
  }
  func.func @transform_6(%arg0: i32) -> (i32, i32) {
    %c0_i32 = arith.constant 0 : i32
    %c0_i32_0 = arith.constant 0 : i32
    %c0_i32_1 = arith.constant 0 : i32
    return %c0_i32, %c0_i32_0 : i32, i32
  }
  func.func @transform_7(%arg0: i32) -> (i32, i32) {
    %c0_i32 = arith.constant 0 : i32
    %c0_i32_0 = arith.constant 0 : i32
    %c0_i32_1 = arith.constant 0 : i32
    return %c0_i32, %c0_i32_0 : i32, i32
  }
  func.func @transform_8(%arg0: i32) -> (i32, i32) {
    %c0_i32 = arith.constant 0 : i32
    %c0_i32_0 = arith.constant 0 : i32
    %c0_i32_1 = arith.constant 0 : i32
    return %c0_i32, %c0_i32_0 : i32, i32
  }
  func.func @transform_9(%arg0: i32) -> (i32, i32) {
    %c0_i32 = arith.constant 0 : i32
    %c0_i32_0 = arith.constant 0 : i32
    %c0_i32_1 = arith.constant 0 : i32
    return %c0_i32, %c0_i32_0 : i32, i32
  }
  func.func @transform_10(%arg0: i32) -> (i32, i32) {
    %c0_i32 = arith.constant 0 : i32
    %c0_i32_0 = arith.constant 0 : i32
    %c0_i32_1 = arith.constant 0 : i32
    return %c0_i32, %c0_i32_0 : i32, i32
  }
  func.func @transform_11(%arg0: i32) -> (i32, i32) {
    %c0_i32 = arith.constant 0 : i32
    %c0_i32_0 = arith.constant 0 : i32
    %c0_i32_1 = arith.constant 0 : i32
    return %c0_i32, %c0_i32_0 : i32, i32
  }
  func.func @transform_12(%arg0: i32) -> (i32, i32) {
    %c0_i32 = arith.constant 0 : i32
    %c0_i32_0 = arith.constant 0 : i32
    return %arg0, %c0_i32 : i32, i32
  }
  func.func @transform_13(%arg0: i32) -> (i32, i32) {
    %c0_i32 = arith.constant 0 : i32
    %c0_i32_0 = arith.constant 0 : i32
    return %arg0, %c0_i32 : i32, i32
  }
}

</mosaic_0001>

<bundles_post_ra>
// kernel: cvae_forward.1
= control target key start
LH: loop header
LB: loop body
LE: loop exit
PB: predicated region body
PF: predicated region fallthrough
CT: control target
= control target key end

     0   :  { %s6181_s25 = smov 0   ;;  %s7945_s0 = inlined_call_operand.vmem [shape: bf16[16,784], index: 0, kind: input, shape index: {}]   ;;  %s7946_s1 = inlined_call_operand.vmem [shape: s32[16,1], index: 1, kind: input, shape index: {}]   ;;  %s7947_s2 = inlined_call_operand.vmem [shape: f32[16,20], index: 2, kind: input, shape index: {}]   ;;  %s7948_s3 = inlined_call_operand.vmem [shape: bf16[784,512], index: 3, kind: input, shape index: {}]   ;;  %s7949_s4 = inlined_call_operand.vmem [shape: f32[1,512], index: 4, kind: input, shape index: {}]   ;;  %s7950_s5 = inlined_call_operand.vmem [shape: f32[10,1024], index: 5, kind: input, shape index: {}]   ;;  %s7951_s6 = inlined_call_operand.vmem [shape: f32[512,40], index: 6, kind: input, shape index: {}]   ;;  %s7952_s7 = inlined_call_operand.vmem [shape: f32[1,40], index: 7, kind: input, shape index: {}]   ;;  %s7953_s8 = inlined_call_operand.vmem [shape: f32[20,512], index: 8, kind: input, shape index: {}]   ;;  %s7954_s9 = inlined_call_operand.vmem [shape: f32[1,512], index: 9, kind: input, shape index: {}]   ;;  %s7955_s10 = inlined_call_operand.vmem [shape: bf16[512,784], index: 10, kind: input, shape index: {}]   ;;  %s7956_s11 = inlined_call_operand.vmem [shape: f32[1,784], index: 11, kind: input, shape index: {}]   ;;  %s7957_s12 = inlined_call_operand.vmem [shape: f32[16,784], index: 12, kind: output, shape index: {0}]   ;;  %s7958_s13 = inlined_call_operand.vmem [shape: f32[16,40], index: 13, kind: output, shape index: {1}]  }
   0x1 LB: > { %s4741_s26 = sadd.s32 4294967295, %s6105_s25   ;;  %p4745_p0 = scmp.ge.s32.totalorder %s6105_s25, 1  ;;  %s6105_s25 = sphi %s6181_s25, %s24_s25  }
   0x2   : > { %p408_p1 = scmp.lt.s32.totalorder %s6105_s25, 3 }
   0x4   : > { %p409_p2 = pnand %p4745_p0, %p408_p1 }
   0x5   : > { %p464_p3 = scmp.lt.s32.totalorder (!%p409_p2), %s4741_s26, 1  ;;  %v496_v0 = vld [vmem:[%s7950_s5 + $0x8] sm:$0xff] (!%p409_p2)  ;;  %vm515_vm0 = vcmask (!%p409_p2), 1041408   ;;  %v6107_v2 = vmov (!%p409_p2), 0   ;;  %v498_v4 = vld [vmem:[%s7950_s5 + $0x18] sm:$0xff] (!%p409_p2)  ;;  %v495_v6 = vld [vmem:[%s7950_s5] sm:$0xff] (!%p409_p2)  ;;  %v487_v22 = vlaneseq (!%p409_p2) }
   0x6   : > { %412 = sbr.rel (%p409_p2) target bundleno = 1580 (0x62c), region = 68  ;;  %v504_v1 = vld [vmem:[%s7950_s5 + $0x48] sm:$0x3] (!%p409_p2)  ;;  %5447 = vset.pattern.permute.xlu0 (!%p409_p2), %v6107_v2  ;;  %v506_v5 = vld [vmem:[%s7950_s5 + $0x58] sm:$0x3] (!%p409_p2)  ;;  %vm6108_vm1 = vmmov (!%p409_p2), 1  }
   0x7   : > { %v5315_v3 = vpack.c.bf16 (!%p409_p2), %v504_v1, %v496_v0  ;;  %vm6207_vm2 = vmpackc.low (!%p409_p2), %vm515_vm0, %vm6108_vm1  ;;  %v5321_v8 = vpack.c.bf16 (!%p409_p2), %v506_v5, %v498_v4  ;;  %v503_v9 = vld [vmem:[%s7950_s5 + $0x40] sm:$0x3] (!%p409_p2)  ;;  %v497_v10 = vld [vmem:[%s7950_s5 + $0x10] sm:$0xff] (!%p409_p2)  ;;  %v6109_v11 = vmov (!%p409_p2), 0.0   ;;  %v488_v25 = vand.u32 (!%p409_p2), 127, %v487_v22 }
   0x8   : > { %604 = vmatprep.mubr.f32.mxu0 (!%p409_p2), %v6109_v11  ;;  %675 = vmatprep.mubr.f32.mxu1 (!%p409_p2), %v6109_v11  ;;  %v5318_v12 = vpack.c.bf16 (!%p409_p2), %v503_v9, %v495_v6  ;;  %v505_v13 = vld [vmem:[%s7950_s5 + $0x50] sm:$0x3] (!%p409_p2)  ;;  %v500_v15 = vld [vmem:[%s7950_s5 + $0x28] sm:$0xff] (!%p409_p2)  ;;  %v502_v17 = vld [vmem:[%s7950_s5 + $0x38] sm:$0xff] (!%p409_p2)  ;;  %vm511_vm3 = vcmask (!%p409_p2), 80896   ;;  %vm2028_vm5 = vcmask (!%p409_p2), 130048  }
   0x9   : > { %5317 = vmatprep.subr.msk.bf16.mxu0 (!%p409_p2), %vm6207_vm2, %v5315_v3  ;;  %5323 = vmatprep.subr.msk.bf16.mxu1 (!%p409_p2), %vm6207_vm2, %v5321_v8  ;;  %v5324_v14 = vpack.c.bf16 (!%p409_p2), %v505_v13, %v497_v10  ;;  %v508_v16 = vld [vmem:[%s7950_s5 + $0x68] sm:$0x3] (!%p409_p2)  ;;  %v510_v20 = vld [vmem:[%s7950_s5 + $0x78] sm:$0x3] (!%p409_p2)  ;;  %v499_v23 = vld [vmem:[%s7950_s5 + $0x20] sm:$0xff] (!%p409_p2)  ;;  %vm4629_vm6 = vcmask (!%p409_p2), 326656  }
   0xa   : > { %5320 = vmatpush1.bf16.msk.msra.mxu0 (!%p409_p2), %vm6207_vm2, %v5318_v12  ;;  %v5327_v19 = vpack.c.bf16 (!%p409_p2), %v508_v16, %v500_v15  ;;  %v5333_v21 = vpack.c.bf16 (!%p409_p2), %v510_v20, %v502_v17  ;;  %v507_v24 = vld [vmem:[%s7950_s5 + $0x60] sm:$0x3] (!%p409_p2)  ;;  %v501_v26 = vld [vmem:[%s7950_s5 + $0x30] sm:$0xff] (!%p409_p2)  ;;  %vm2627_vm7 = vcmask (!%p409_p2), 1043456   ;;  %vm2623_vm8 = vcmask (!%p409_p2), 162816  }
   0xb   : > { %5326 = vmatpush1.bf16.msk.msra.mxu1 (!%p409_p2), %vm6207_vm2, %v5324_v14  ;;  %v509_v27 = vld [vmem:[%s7950_s5 + $0x70] sm:$0x3] (!%p409_p2)  ;;  %v5330_v29 = vpack.c.bf16 (!%p409_p2), %v507_v24, %v499_v23  ;;  %v5450_v31 = vld [vmem:[%s7948_s3 + $0x4] ss:$16 sps:$4 sm:$0xff] (!%p409_p2)  }
   0xc   : > { %5329 = vmatprep.subr.msk.bf16.mxu0 (!%p409_p2), %vm6207_vm2, %v5327_v19  ;;  %5335 = vmatprep.subr.msk.bf16.mxu1 (!%p409_p2), %vm6207_vm2, %v5333_v21  ;;  %v5336_v30 = vpack.c.bf16 (!%p409_p2), %v509_v27, %v501_v26  ;;  %v5453_v32 = vld [vmem:[%s7948_s3 + $0x204] ss:$16 sps:$4 sm:$0xff] (!%p409_p2)   ;;  %v5448_v36 = vld [vmem:[%s7948_s3] ss:$16 sps:$4 sm:$0xff] (!%p409_p2)  }
   0xd   : > { %s7962_s26 = smov (!%p464_p3, %s4741_s26), 1  ;;  %v5451_v37 = vld [vmem:[%s7948_s3 + $0x200] ss:$16 sps:$4 sm:$0xff]   ;;  %v5456_v38 = vld [vmem:[%s7948_s3 + $0x24] ss:$16 sps:$4 sm:$0xff]  }
   0xe   : > { %s6225_s28 = sshll.u32 %s7962_s26, 3  ;;  %s5433_s23 = smul.u32 28, %s7962_s26  ;;  %v5459_v39 = vld [vmem:[%s7948_s3 + $0x224] ss:$16 sps:$4 sm:$0xff]   ;;  %v5454_v40 = vld [vmem:[%s7948_s3 + $0x20] ss:$16 sps:$4 sm:$0xff]  }
   0xf   : > { %s472_s14 = scalar_lea.vmem %s7946_s1, %s6225_s28  ;;  %v5457_v43 = vld [vmem:[%s7948_s3 + $0x220] ss:$16 sps:$4 sm:$0xff]   ;;  %v5462_v44 = vld [vmem:[%s7948_s3 + $0x44] ss:$16 sps:$4 sm:$0xff]   ;;  %s485_s15 = scalar_lea.vmem %s7958_s13, %s6225_s28 }
  0x10   : > { %v489_v18 = vld [vmem:[%s472_s14] sm:$0xff]  ;;  %s6257_s29 = scalar_lea.vmem %s7945_s0, %s5433_s23  ;;  %s6110_s14 = smov 108  }
  0x11   : > { %491 = vperm.xlu0 %5447, %v489_v18   ;;  %v6279_v33 = vld [vmem:[%s6257_s29] sm:$0xff]  ;;  %v6282_v34 = vld [vmem:[%s6257_s29 + $0x8] sm:$0xff]  ;;  %s5434_s16 = smul.u32 56, %s7962_s26 }
  0x12   : > { %v6310_v41 = vcombine.high %v6279_v33, %v6279_v33  ;;  %v6314_v42 = vcombine.high %v6282_v34, %v6282_v34  ;;  %v5465_v45 = vld [vmem:[%s7948_s3 + $0x244] ss:$16 sps:$4 sm:$0xff]   ;;  %v5460_v46 = vld [vmem:[%s7948_s3 + $0x40] ss:$16 sps:$4 sm:$0xff]  }
  0x13   : > { %v5463_v47 = vld [vmem:[%s7948_s3 + $0x240] ss:$16 sps:$4 sm:$0xff]   ;;  %v5468_v48 = vld [vmem:[%s7948_s3 + $0x64] ss:$16 sps:$4 sm:$0xff]   ;;  %s7926_s18 = scalar_lea.vmem %s7957_s12, %s5434_s16 }
  0x14   : > { %v5471_v49 = vld [vmem:[%s7948_s3 + $0x264] ss:$16 sps:$4 sm:$0xff]   ;;  %v5466_v50 = vld [vmem:[%s7948_s3 + $0x60] ss:$16 sps:$4 sm:$0xff]  }
  0x15   : > { %v5469_v51 = vld [vmem:[%s7948_s3 + $0x260] ss:$16 sps:$4 sm:$0xff]   ;;  %v5474_v52 = vld [vmem:[%s7948_s3 + $0x84] ss:$16 sps:$4 sm:$0xff]  }
  0x16   : > { %v5477_v53 = vld [vmem:[%s7948_s3 + $0x284] ss:$16 sps:$4 sm:$0xff]   ;;  %v5472_v54 = vld [vmem:[%s7948_s3 + $0x80] ss:$16 sps:$4 sm:$0xff]  }
  0x17   : > { %v5475_v55 = vld [vmem:[%s7948_s3 + $0x280] ss:$16 sps:$4 sm:$0xff]   ;;  %v5480_v56 = vld [vmem:[%s7948_s3 + $0xa4] ss:$16 sps:$4 sm:$0xff]  }
  0x18   : > { %v5483_v57 = vld [vmem:[%s7948_s3 + $0x2a4] ss:$16 sps:$4 sm:$0xff]   ;;  %v5478_v58 = vld [vmem:[%s7948_s3 + $0xa0] ss:$16 sps:$4 sm:$0xff]  }
  0x19   : > { %v5481_v59 = vld [vmem:[%s7948_s3 + $0x2a0] ss:$16 sps:$4 sm:$0xff]   ;;  %v5486_v60 = vld [vmem:[%s7948_s3 + $0xc4] ss:$16 sps:$4 sm:$0xff]  }
  0x1a   : > { %v5489_v61 = vld [vmem:[%s7948_s3 + $0x2c4] ss:$16 sps:$4 sm:$0xff]   ;;  %v5484_v62 = vld [vmem:[%s7948_s3 + $0xc0] ss:$16 sps:$4 sm:$0xff]  }
  0x1b   : > { %v5487_v63 = vld [vmem:[%s7948_s3 + $0x2c0] ss:$16 sps:$4 sm:$0xff]   ;;  %v5492_v0 = vld [vmem:[%s7948_s3 + $0xe4] ss:$16 sps:$4 sm:$0xff]  }
  0x1c   : > { %v5495_v1 = vld [vmem:[%s7948_s3 + $0x2e4] ss:$16 sps:$4 sm:$0xff]   ;;  %v5490_v3 = vld [vmem:[%s7948_s3 + $0xe0] ss:$16 sps:$4 sm:$0xff]  }
  0x1d   : > { %v5493_v4 = vld [vmem:[%s7948_s3 + $0x2e0] ss:$16 sps:$4 sm:$0xff]   ;;  %v5498_v5 = vld [vmem:[%s7948_s3 + $0x104] ss:$16 sps:$4 sm:$0xff]  }
  0x1e   : > { %v5501_v6 = vld [vmem:[%s7948_s3 + $0x304] ss:$16 sps:$4 sm:$0xff]   ;;  %v5496_v7 = vld [vmem:[%s7948_s3 + $0x100] ss:$16 sps:$4 sm:$0xff]  }
  0x1f   : > { %v5499_v8 = vld [vmem:[%s7948_s3 + $0x300] ss:$16 sps:$4 sm:$0xff]   ;;  %v5504_v9 = vld [vmem:[%s7948_s3 + $0x124] ss:$16 sps:$4 sm:$0xff]  }
  0x20   : > { %v5507_v10 = vld [vmem:[%s7948_s3 + $0x324] ss:$16 sps:$4 sm:$0xff]   ;;  %v5502_v12 = vld [vmem:[%s7948_s3 + $0x120] ss:$16 sps:$4 sm:$0xff]  }
  0x21   : > { %v5505_v13 = vld [vmem:[%s7948_s3 + $0x320] ss:$16 sps:$4 sm:$0xff]   ;;  %v5510_v14 = vld [vmem:[%s7948_s3 + $0x144] ss:$16 sps:$4 sm:$0xff]  }
  0x22   : > { %v5513_v15 = vld [vmem:[%s7948_s3 + $0x344] ss:$16 sps:$4 sm:$0xff]   ;;  %v5508_v16 = vld [vmem:[%s7948_s3 + $0x140] ss:$16 sps:$4 sm:$0xff]  }
  0x23   : > { %v5511_v17 = vld [vmem:[%s7948_s3 + $0x340] ss:$16 sps:$4 sm:$0xff]   ;;  %v5516_v18 = vld [vmem:[%s7948_s3 + $0x164] ss:$16 sps:$4 sm:$0xff]  }
  0x24   : > { %v5519_v19 = vld [vmem:[%s7948_s3 + $0x364] ss:$16 sps:$4 sm:$0xff]   ;;  %v5514_v20 = vld [vmem:[%s7948_s3 + $0x160] ss:$16 sps:$4 sm:$0xff]  }
  0x25   : > { %v5517_v21 = vld [vmem:[%s7948_s3 + $0x360] ss:$16 sps:$4 sm:$0xff]   ;;  %v5522_v23 = vld [vmem:[%s7948_s3 + $0x184] ss:$16 sps:$4 sm:$0xff]  }
  0x26   : > { %v5525_v24 = vld [vmem:[%s7948_s3 + $0x384] ss:$16 sps:$4 sm:$0xff]   ;;  %v5523_v26 = vld [vmem:[%s7948_s3 + $0x380] ss:$16 sps:$4 sm:$0xff]  }
  0x27   : > { %v5528_v27 = vld [vmem:[%s7948_s3 + $0x1a4] ss:$16 sps:$4 sm:$0xff]  }
  0x90   : > { %v492_v28 = vpop.permute.xlu0 %491 }
  0x91   : > { %vm493_vm4 = vcmp.eq.s32.totalorder %v488_v25, %v492_v28  ;;  %v5520_v25 = vld [vmem:[%s7948_s3 + $0x180] ss:$16 sps:$4 sm:$0xff]   ;;  %v5531_v28 = vld [vmem:[%s7948_s3 + $0x3a4] ss:$16 sps:$4 sm:$0xff]  }
  0x92   : > { %v494_v35 = vsel %vm493_vm4, 1.0, %v6109_v11 }
  0x93   : > { %4753 = vmatmul.mubr.msk.f32.vlgmr.msra.gmra.mrb[0].mxu0 %vm511_vm3, %v494_v35  ;;  %4756 = vmatmul.mubr.msk.f32.vlgmr.msra.gmra.mrb[0].mxu1 %vm511_vm3, %v494_v35 }
  0x94   : > { %5332 = vmatpush1.bf16.msk.msra.mxu0 %vm6207_vm2, %v5330_v29  ;;  %5338 = vmatpush1.bf16.msk.msra.mxu1 %vm6207_vm2, %v5336_v30  ;;  %v5526_v29 = vld [vmem:[%s7948_s3 + $0x1a0] ss:$16 sps:$4 sm:$0xff]  }
  0x95   : > { %746 = vmatprep.mubr.f32.mxu0 %v6109_v11  ;;  %817 = vmatprep.mubr.f32.mxu1 %v6109_v11  ;;  %v5529_v30 = vld [vmem:[%s7948_s3 + $0x3a0] ss:$16 sps:$4 sm:$0xff]  }
  0x96   : > { %2032 = vmatprep.subr.bf16.mxu0 %v5450_v31  ;;  %2073 = vmatprep.subr.bf16.mxu1 %v5453_v32  ;;  %v5534_v31 = vld [vmem:[%s7948_s3 + $0x1c4] ss:$16 sps:$4 sm:$0xff]  }
  0x97   : > { %4759 = vmatmul.mubr.msk.f32.vlgmr.msra.gmra.mrb[2].mxu0 %vm511_vm3, %v494_v35  ;;  %4762 = vmatmul.mubr.msk.f32.vlgmr.msra.gmra.mrb[2].mxu1 %vm511_vm3, %v494_v35  ;;  %v5537_v32 = vld [vmem:[%s7948_s3 + $0x3c4] ss:$16 sps:$4 sm:$0xff]   ;;  %v5532_v35 = vld [vmem:[%s7948_s3 + $0x1c0] ss:$16 sps:$4 sm:$0xff]  }
  0x98   : > { %2033 = vmatpush1.bf16.msra.mxu0 %v5448_v36  ;;  %2074 = vmatpush1.bf16.msra.mxu1 %v5451_v37  ;;  %v5535_v36 = vld [vmem:[%s7948_s3 + $0x3c0] ss:$16 sps:$4 sm:$0xff]   ;;  %v5540_v37 = vld [vmem:[%s7948_s3 + $0x1e4] ss:$16 sps:$4 sm:$0xff]  }
  0x99   : > { %2034 = vmatprep.subr.bf16.mxu0 %v5456_v38  ;;  %2075 = vmatprep.subr.bf16.mxu1 %v5459_v39  ;;  %v5543_v38 = vld [vmem:[%s7948_s3 + $0x3e4] ss:$16 sps:$4 sm:$0xff]   ;;  %v5538_v39 = vld [vmem:[%s7948_s3 + $0x1e0] ss:$16 sps:$4 sm:$0xff]  }
  0x9a   : > { %2064 = vmatprep.mubr.bf16.mxu0 %v6310_v41  ;;  %2105 = vmatprep.mubr.bf16.mxu1 %v6314_v42 }
  0x9c   : > { %2035 = vmatpush1.bf16.msra.mxu0 %v5454_v40  ;;  %2076 = vmatpush1.bf16.msra.mxu1 %v5457_v43  ;;  %v5541_v40 = vld [vmem:[%s7948_s3 + $0x3e0] ss:$16 sps:$4 sm:$0xff]   ;;  %v5550_v43 = vld [vmem:[%s7948_s3 + $0x404] ss:$16 sps:$4 sm:$0xff]  }
  0x9d   : > { %2036 = vmatprep.subr.bf16.mxu0 %v5462_v44  ;;  %2077 = vmatprep.subr.bf16.mxu1 %v5465_v45  ;;  %v5553_v44 = vld [vmem:[%s7948_s3 + $0x604] ss:$16 sps:$4 sm:$0xff]  }
  0x9e   : > { %v6498_v45 = vld [vmem:[%s6257_s29 + $0x10] sm:$0xff] }
  0xa0   : > { %2037 = vmatpush1.bf16.msra.mxu0 %v5460_v46  ;;  %2078 = vmatpush1.bf16.msra.mxu1 %v5463_v47  ;;  %v5548_v46 = vld [vmem:[%s7948_s3 + $0x400] ss:$16 sps:$4 sm:$0xff]  }
  0xa1   : > { %2038 = vmatprep.subr.bf16.mxu0 %v5468_v48  ;;  %2079 = vmatprep.subr.bf16.mxu1 %v5471_v49  ;;  %v5551_v47 = vld [vmem:[%s7948_s3 + $0x600] ss:$16 sps:$4 sm:$0xff]   ;;  %v6508_v48 = vcombine.low %v6279_v33, %v6279_v33  ;;  %v6512_v49 = vcombine.low %v6282_v34, %v6282_v34  ;;  %v6522_v33 = vcombine.high %v6498_v45, %v6498_v45 }
  0xa2   : > { %v5554_v34 = vld [vmem:[%s7948_s3 + $0x420] ss:$16 sps:$4 sm:$0xff]  }
  0xa4   : > { %2039 = vmatpush1.bf16.msra.mxu0 %v5466_v50  ;;  %2080 = vmatpush1.bf16.msra.mxu1 %v5469_v51  ;;  %v5556_v50 = vld [vmem:[%s7948_s3 + $0x424] ss:$16 sps:$4 sm:$0xff]   ;;  %v5559_v51 = vld [vmem:[%s7948_s3 + $0xc] ss:$16 sps:$4 sm:$0xff]  }
  0xa5   : > { %2040 = vmatprep.subr.bf16.mxu0 %v5474_v52  ;;  %2081 = vmatprep.subr.bf16.mxu1 %v5477_v53  ;;  %v5562_v52 = vld [vmem:[%s7948_s3 + $0x444] ss:$16 sps:$4 sm:$0xff]   ;;  %v6534_v53 = vld [vmem:[%s6257_s29 + $0x18] ss:$0 sps:$4 sm:$0xff]   ;;  %s476_s29 = scalar_lea.vmem %s7947_s2, %s6225_s28 }
  0xa8   : > { %2041 = vmatpush1.bf16.msra.mxu0 %v5472_v54  ;;  %2082 = vmatpush1.bf16.msra.mxu1 %v5475_v55  ;;  %v5557_v54 = vld [vmem:[%s7948_s3 + $0x8] ss:$16 sps:$4 sm:$0xff]   ;;  %v5560_v55 = vld [vmem:[%s7948_s3 + $0x440] ss:$16 sps:$4 sm:$0xff]  }
  0xa9   : > { %2042 = vmatprep.subr.bf16.mxu0 %v5480_v56  ;;  %2083 = vmatprep.subr.bf16.mxu1 %v5483_v57  ;;  %v5566_v56 = vld [vmem:[%s7948_s3 + $0x2c] ss:$16 sps:$4 sm:$0xff]   ;;  %v5569_v57 = vld [vmem:[%s7948_s3 + $0x464] ss:$16 sps:$4 sm:$0xff]  }
  0xac   : > { %2043 = vmatpush1.bf16.msra.mxu0 %v5478_v58  ;;  %2084 = vmatpush1.bf16.msra.mxu1 %v5481_v59  ;;  %v5564_v58 = vld [vmem:[%s7948_s3 + $0x28] ss:$16 sps:$4 sm:$0xff]   ;;  %v5567_v59 = vld [vmem:[%s7948_s3 + $0x460] ss:$16 sps:$4 sm:$0xff]  }
  0xad   : > { %2044 = vmatprep.subr.bf16.mxu0 %v5486_v60  ;;  %2085 = vmatprep.subr.bf16.mxu1 %v5489_v61  ;;  %v5572_v60 = vld [vmem:[%s7948_s3 + $0x4c] ss:$16 sps:$4 sm:$0xff]   ;;  %v5575_v61 = vld [vmem:[%s7948_s3 + $0x484] ss:$16 sps:$4 sm:$0xff]  }
  0xb0   : > { %2045 = vmatpush1.bf16.msra.mxu0 %v5484_v62  ;;  %2086 = vmatpush1.bf16.msra.mxu1 %v5487_v63  ;;  %v5570_v62 = vld [vmem:[%s7948_s3 + $0x48] ss:$16 sps:$4 sm:$0xff]   ;;  %v5573_v63 = vld [vmem:[%s7948_s3 + $0x480] ss:$16 sps:$4 sm:$0xff]  }
  0xb1   : > { %2046 = vmatprep.subr.bf16.mxu0 %v5492_v0  ;;  %2087 = vmatprep.subr.bf16.mxu1 %v5495_v1  ;;  %v5578_v0 = vld [vmem:[%s7948_s3 + $0x6c] ss:$16 sps:$4 sm:$0xff]   ;;  %v5581_v1 = vld [vmem:[%s7948_s3 + $0x4a4] ss:$16 sps:$4 sm:$0xff]  }
  0xb4   : > { %2047 = vmatpush1.bf16.msra.mxu0 %v5490_v3  ;;  %2088 = vmatpush1.bf16.msra.mxu1 %v5493_v4  ;;  %v5576_v3 = vld [vmem:[%s7948_s3 + $0x68] ss:$16 sps:$4 sm:$0xff]   ;;  %v5584_v4 = vld [vmem:[%s7948_s3 + $0x8c] ss:$16 sps:$4 sm:$0xff]  }
  0xb5   : > { %2048 = vmatprep.subr.bf16.mxu0 %v5498_v5  ;;  %2089 = vmatprep.subr.bf16.mxu1 %v5501_v6  ;;  %v5587_v5 = vld [vmem:[%s7948_s3 + $0x4c4] ss:$16 sps:$4 sm:$0xff]   ;;  %v5582_v6 = vld [vmem:[%s7948_s3 + $0x88] ss:$16 sps:$4 sm:$0xff]  }
  0xb8   : > { %2049 = vmatpush1.bf16.msra.mxu0 %v5496_v7  ;;  %2090 = vmatpush1.bf16.msra.mxu1 %v5499_v8  ;;  %v5585_v7 = vld [vmem:[%s7948_s3 + $0x4c0] ss:$16 sps:$4 sm:$0xff]   ;;  %v5590_v8 = vld [vmem:[%s7948_s3 + $0xac] ss:$16 sps:$4 sm:$0xff]  }
  0xb9   : > { %2050 = vmatprep.subr.bf16.mxu0 %v5504_v9  ;;  %2091 = vmatprep.subr.bf16.mxu1 %v5507_v10  ;;  %v5593_v9 = vld [vmem:[%s7948_s3 + $0x4e4] ss:$16 sps:$4 sm:$0xff]   ;;  %v5588_v10 = vld [vmem:[%s7948_s3 + $0xa8] ss:$16 sps:$4 sm:$0xff]  }
  0xbc   : > { %2051 = vmatpush1.bf16.msra.mxu0 %v5502_v12  ;;  %2092 = vmatpush1.bf16.msra.mxu1 %v5505_v13  ;;  %v5591_v12 = vld [vmem:[%s7948_s3 + $0x4e0] ss:$16 sps:$4 sm:$0xff]   ;;  %v5596_v13 = vld [vmem:[%s7948_s3 + $0xcc] ss:$16 sps:$4 sm:$0xff]  }
  0xbd   : > { %2052 = vmatprep.subr.bf16.mxu0 %v5510_v14  ;;  %2093 = vmatprep.subr.bf16.mxu1 %v5513_v15  ;;  %v5599_v14 = vld [vmem:[%s7948_s3 + $0x504] ss:$16 sps:$4 sm:$0xff]   ;;  %v5594_v15 = vld [vmem:[%s7948_s3 + $0xc8] ss:$16 sps:$4 sm:$0xff]  }
  0xc0   : > { %2053 = vmatpush1.bf16.msra.mxu0 %v5508_v16  ;;  %2094 = vmatpush1.bf16.msra.mxu1 %v5511_v17  ;;  %v5597_v16 = vld [vmem:[%s7948_s3 + $0x500] ss:$16 sps:$4 sm:$0xff]   ;;  %v5602_v17 = vld [vmem:[%s7948_s3 + $0xec] ss:$16 sps:$4 sm:$0xff]  }
  0xc1   : > { %2054 = vmatprep.subr.bf16.mxu0 %v5516_v18  ;;  %2095 = vmatprep.subr.bf16.mxu1 %v5519_v19  ;;  %v5605_v18 = vld [vmem:[%s7948_s3 + $0x524] ss:$16 sps:$4 sm:$0xff]   ;;  %v5600_v19 = vld [vmem:[%s7948_s3 + $0xe8] ss:$16 sps:$4 sm:$0xff]  }
  0xc4   : > { %2055 = vmatpush1.bf16.msra.mxu0 %v5514_v20  ;;  %2096 = vmatpush1.bf16.msra.mxu1 %v5517_v21  ;;  %v5603_v20 = vld [vmem:[%s7948_s3 + $0x520] ss:$16 sps:$4 sm:$0xff]   ;;  %v5608_v21 = vld [vmem:[%s7948_s3 + $0x10c] ss:$16 sps:$4 sm:$0xff]  }
  0xc5   : > { %2056 = vmatprep.subr.bf16.mxu0 %v5522_v23  ;;  %2097 = vmatprep.subr.bf16.mxu1 %v5525_v24  ;;  %v5611_v23 = vld [vmem:[%s7948_s3 + $0x544] ss:$16 sps:$4 sm:$0xff]   ;;  %v5606_v24 = vld [vmem:[%s7948_s3 + $0x108] ss:$16 sps:$4 sm:$0xff]  }
  0xc8   : > { %2057 = vmatpush1.bf16.msra.mxu0 %v5520_v25  ;;  %2098 = vmatpush1.bf16.msra.mxu1 %v5523_v26  ;;  %v5609_v25 = vld [vmem:[%s7948_s3 + $0x540] ss:$16 sps:$4 sm:$0xff]   ;;  %v5614_v26 = vld [vmem:[%s7948_s3 + $0x12c] ss:$16 sps:$4 sm:$0xff]  }
  0xc9   : > { %2058 = vmatprep.subr.bf16.mxu0 %v5528_v27  ;;  %2099 = vmatprep.subr.bf16.mxu1 %v5531_v28  ;;  %v5617_v27 = vld [vmem:[%s7948_s3 + $0x564] ss:$16 sps:$4 sm:$0xff]   ;;  %v5612_v28 = vld [vmem:[%s7948_s3 + $0x128] ss:$16 sps:$4 sm:$0xff]  }
  0xcc   : > { %2059 = vmatpush1.bf16.msra.mxu0 %v5526_v29  ;;  %2100 = vmatpush1.bf16.msra.mxu1 %v5529_v30  ;;  %v5615_v29 = vld [vmem:[%s7948_s3 + $0x560] ss:$16 sps:$4 sm:$0xff]   ;;  %v5620_v30 = vld [vmem:[%s7948_s3 + $0x14c] ss:$16 sps:$4 sm:$0xff]  }
  0xcd   : > { %2060 = vmatprep.subr.bf16.mxu0 %v5534_v31  ;;  %2101 = vmatprep.subr.bf16.mxu1 %v5537_v32  ;;  %v5623_v31 = vld [vmem:[%s7948_s3 + $0x584] ss:$16 sps:$4 sm:$0xff]   ;;  %v5618_v32 = vld [vmem:[%s7948_s3 + $0x148] ss:$16 sps:$4 sm:$0xff]  }
  0xd0   : > { %2061 = vmatpush1.bf16.msra.mxu0 %v5532_v35  ;;  %2102 = vmatpush1.bf16.msra.mxu1 %v5535_v36  ;;  %v5621_v35 = vld [vmem:[%s7948_s3 + $0x580] ss:$16 sps:$4 sm:$0xff]   ;;  %v5626_v36 = vld [vmem:[%s7948_s3 + $0x16c] ss:$16 sps:$4 sm:$0xff]  }
  0xd1   : > { %2062 = vmatprep.subr.bf16.mxu0 %v5540_v37  ;;  %2103 = vmatprep.subr.bf16.mxu1 %v5543_v38  ;;  %v5629_v37 = vld [vmem:[%s7948_s3 + $0x5a4] ss:$16 sps:$4 sm:$0xff]   ;;  %v5624_v38 = vld [vmem:[%s7948_s3 + $0x168] ss:$16 sps:$4 sm:$0xff]  }
  0xd4   : > { %2063 = vmatpush1.bf16.msra.mxu0 %v5538_v39  ;;  %2104 = vmatpush1.bf16.msra.mxu1 %v5541_v40  ;;  %v5627_v39 = vld [vmem:[%s7948_s3 + $0x5a0] ss:$16 sps:$4 sm:$0xff]   ;;  %v5632_v40 = vld [vmem:[%s7948_s3 + $0x18c] ss:$16 sps:$4 sm:$0xff]  }
  0xd5   : > { %2114 = vmatprep.subr.bf16.mxu0 %v5550_v43  ;;  %2155 = vmatprep.subr.bf16.mxu1 %v5553_v44  ;;  %v5635_v43 = vld [vmem:[%s7948_s3 + $0x5c4] ss:$16 sps:$4 sm:$0xff]   ;;  %v5630_v44 = vld [vmem:[%s7948_s3 + $0x188] ss:$16 sps:$4 sm:$0xff]  }
  0xd7   : > { %2065 = vmatmul.mubr.bf16.vlgmr.msra.gmra.mrb[4].mxu0 %v6508_v48  ;;  %2106 = vmatmul.mubr.bf16.vlgmr.msra.gmra.mrb[4].mxu1 %v6512_v49 }
  0xd8   : > { %2115 = vmatpush1.bf16.msra.mxu0 %v5548_v46  ;;  %2156 = vmatpush1.bf16.msra.mxu1 %v5551_v47  ;;  %v5633_v46 = vld [vmem:[%s7948_s3 + $0x5c0] ss:$16 sps:$4 sm:$0xff]   ;;  %v5638_v47 = vld [vmem:[%s7948_s3 + $0x1ac] ss:$16 sps:$4 sm:$0xff]  }
  0xd9   : > { %2116 = vmatprep.subr.bf16.mxu0 %v5556_v50  ;;  %2187 = vmatprep.mubr.bf16.mxu1 %v6107_v2  ;;  %v5641_v50 = vld [vmem:[%s7948_s3 + $0x5e4] ss:$16 sps:$4 sm:$0xff]  }
  0xda   : > { %2196 = vmatprep.subr.bf16.mxu1 %v5559_v51  ;;  %2146 = vmatprep.mubr.bf16.mxu0 %v6522_v33  ;;  %v5636_v51 = vld [vmem:[%s7948_s3 + $0x1a8] ss:$16 sps:$4 sm:$0xff]  }
  0xdc   : > { %2117 = vmatpush1.bf16.msra.mxu0 %v5554_v34  ;;  %v5639_v34 = vld [vmem:[%s7948_s3 + $0x5e0] ss:$16 sps:$4 sm:$0xff]  }
  0xdd   : > { %2118 = vmatprep.subr.bf16.mxu0 %v5562_v52  ;;  %v5646_v52 = vld [vmem:[%s7948_s3 + $0x1cc] ss:$16 sps:$4 sm:$0xff]  }
  0xdf   : > { %4966 = vmatmul.mubr.msk.bf16.vlgmr.msra.gmra.mrb[8].mxu1 %vm2028_vm5, %v6534_v53 }
  0xe0   : > { %2197 = vmatpush1.bf16.msra.mxu1 %v5557_v54  ;;  %2119 = vmatpush1.bf16.msra.mxu0 %v5560_v55  ;;  %v5649_v54 = vld [vmem:[%s7948_s3 + $0x20c] ss:$16 sps:$4 sm:$0xff]   ;;  %v6710_v55 = vcombine.low %v6498_v45, %v6498_v45 }
  0xe1   : > { %2198 = vmatprep.subr.bf16.mxu1 %v5566_v56  ;;  %2120 = vmatprep.subr.bf16.mxu0 %v5569_v57  ;;  %v5644_v56 = vld [vmem:[%s7948_s3 + $0x1c8] ss:$16 sps:$4 sm:$0xff]   ;;  %v5655_v45 = vld [vmem:[%s7948_s3 + $0x22c] ss:$16 sps:$4 sm:$0xff]  }
  0xe2   : > { %2228 = vmatprep.mubr.bf16.mxu1 %v6310_v41  ;;  %v5579_v41 = vld [vmem:[%s7948_s3 + $0x4a0] ss:$16 sps:$4 sm:$0xff]   ;;  %v5647_v57 = vld [vmem:[%s7948_s3 + $0x208] ss:$16 sps:$4 sm:$0xff]  }
  0xe4   : > { %2199 = vmatpush1.bf16.msra.mxu1 %v5564_v58  ;;  %2121 = vmatpush1.bf16.msra.mxu0 %v5567_v59  ;;  %v5652_v58 = vld [vmem:[%s7948_s3 + $0x1ec] ss:$16 sps:$4 sm:$0xff]   ;;  %v5650_v59 = vld [vmem:[%s7948_s3 + $0x1e8] ss:$16 sps:$4 sm:$0xff]  }
  0xe5   : > { %2200 = vmatprep.subr.bf16.mxu1 %v5572_v60  ;;  %2122 = vmatprep.subr.bf16.mxu0 %v5575_v61  ;;  %v5653_v60 = vld [vmem:[%s7948_s3 + $0x228] ss:$16 sps:$4 sm:$0xff]   ;;  %v5658_v61 = vld [vmem:[%s7948_s3 + $0x40c] ss:$16 sps:$4 sm:$0xff]  }
  0xe8   : > { %2201 = vmatpush1.bf16.msra.mxu1 %v5570_v62  ;;  %2123 = vmatpush1.bf16.msra.mxu0 %v5573_v63  ;;  %v5661_v62 = vld [vmem:[%s7948_s3 + $0x24c] ss:$16 sps:$4 sm:$0xff]   ;;  %v5656_v63 = vld [vmem:[%s7948_s3 + $0x408] ss:$16 sps:$4 sm:$0xff]  }
  0xe9   : > { %2202 = vmatprep.subr.bf16.mxu1 %v5578_v0  ;;  %2124 = vmatprep.subr.bf16.mxu0 %v5581_v1  ;;  %v5659_v0 = vld [vmem:[%s7948_s3 + $0x248] ss:$16 sps:$4 sm:$0xff]   ;;  %v5664_v1 = vld [vmem:[%s7948_s3 + $0x42c] ss:$16 sps:$4 sm:$0xff]  }
  0xec   : > { %2203 = vmatpush1.bf16.msra.mxu1 %v5576_v3  ;;  %2125 = vmatpush1.bf16.msra.mxu0 %v5579_v41  ;;  %v5662_v3 = vld [vmem:[%s7948_s3 + $0x428] ss:$16 sps:$4 sm:$0xff]  }
  0xed   : > { %2204 = vmatprep.subr.bf16.mxu1 %v5584_v4  ;;  %2126 = vmatprep.subr.bf16.mxu0 %v5587_v5  ;;  %v5665_v41 = vld [vmem:[%s7948_s3 + $0x268] ss:$16 sps:$4 sm:$0xff]   ;;  %v5670_v4 = vld [vmem:[%s7948_s3 + $0x44c] ss:$16 sps:$4 sm:$0xff]  }
  0xee   : > { %v5668_v5 = vld [vmem:[%s7948_s3 + $0x448] ss:$16 sps:$4 sm:$0xff]  }
  0xf0   : > { %2205 = vmatpush1.bf16.msra.mxu1 %v5582_v6  ;;  %2127 = vmatpush1.bf16.msra.mxu0 %v5585_v7  ;;  %v5671_v6 = vld [vmem:[%s7948_s3 + $0x288] ss:$16 sps:$4 sm:$0xff]   ;;  %v5676_v7 = vld [vmem:[%s7948_s3 + $0x46c] ss:$16 sps:$4 sm:$0xff]  }
  0xf1   : > { %2206 = vmatprep.subr.bf16.mxu1 %v5590_v8  ;;  %2128 = vmatprep.subr.bf16.mxu0 %v5593_v9  ;;  %v5674_v8 = vld [vmem:[%s7948_s3 + $0x468] ss:$16 sps:$4 sm:$0xff]  }
  0xf2   : > { %v5677_v9 = vld [vmem:[%s7948_s3 + $0x2a8] ss:$16 sps:$4 sm:$0xff]  }
  0xf4   : > { %2207 = vmatpush1.bf16.msra.mxu1 %v5588_v10  ;;  %2129 = vmatpush1.bf16.msra.mxu0 %v5591_v12  ;;  %v5682_v10 = vld [vmem:[%s7948_s3 + $0x48c] ss:$16 sps:$4 sm:$0xff]  }
  0xf5   : > { %2208 = vmatprep.subr.bf16.mxu1 %v5596_v13  ;;  %2130 = vmatprep.subr.bf16.mxu0 %v5599_v14  ;;  %v5685_v12 = vld [vmem:[%s7948_s3 + $0x2cc] ss:$16 sps:$4 sm:$0xff]   ;;  %v5680_v13 = vld [vmem:[%s7948_s3 + $0x488] ss:$16 sps:$4 sm:$0xff]  }
  0xf6   : > { %v5683_v14 = vld [vmem:[%s7948_s3 + $0x2c8] ss:$16 sps:$4 sm:$0xff]  }
  0xf8   : > { %2209 = vmatpush1.bf16.msra.mxu1 %v5594_v15  ;;  %2131 = vmatpush1.bf16.msra.mxu0 %v5597_v16  ;;  %v5688_v15 = vld [vmem:[%s7948_s3 + $0x4ac] ss:$16 sps:$4 sm:$0xff]  }
  0xf9   : > { %2210 = vmatprep.subr.bf16.mxu1 %v5602_v17  ;;  %2132 = vmatprep.subr.bf16.mxu0 %v5605_v18  ;;  %v5691_v16 = vld [vmem:[%s7948_s3 + $0x2ec] ss:$16 sps:$4 sm:$0xff]   ;;  %v5686_v17 = vld [vmem:[%s7948_s3 + $0x4a8] ss:$16 sps:$4 sm:$0xff]  }
  0xfa   : > { %v5689_v18 = vld [vmem:[%s7948_s3 + $0x2e8] ss:$16 sps:$4 sm:$0xff]  }
  0xfc   : > { %2211 = vmatpush1.bf16.msra.mxu1 %v5600_v19  ;;  %2133 = vmatpush1.bf16.msra.mxu0 %v5603_v20  ;;  %v5694_v19 = vld [vmem:[%s7948_s3 + $0x4cc] ss:$16 sps:$4 sm:$0xff]  }
  0xfd   : > { %2212 = vmatprep.subr.bf16.mxu1 %v5608_v21  ;;  %2134 = vmatprep.subr.bf16.mxu0 %v5611_v23  ;;  %v5697_v20 = vld [vmem:[%s7948_s3 + $0x30c] ss:$16 sps:$4 sm:$0xff]   ;;  %v5692_v21 = vld [vmem:[%s7948_s3 + $0x4c8] ss:$16 sps:$4 sm:$0xff]  }
  0xfe   : > { %v5695_v23 = vld [vmem:[%s7948_s3 + $0x308] ss:$16 sps:$4 sm:$0xff]  }
 0x100   : > { %2213 = vmatpush1.bf16.msra.mxu1 %v5606_v24  ;;  %2135 = vmatpush1.bf16.msra.mxu0 %v5609_v25  ;;  %v5700_v24 = vld [vmem:[%s7948_s3 + $0x4ec] ss:$16 sps:$4 sm:$0xff]  }
 0x101   : > { %2214 = vmatprep.subr.bf16.mxu1 %v5614_v26  ;;  %2136 = vmatprep.subr.bf16.mxu0 %v5617_v27  ;;  %v5703_v25 = vld [vmem:[%s7948_s3 + $0x32c] ss:$16 sps:$4 sm:$0xff]   ;;  %v5698_v26 = vld [vmem:[%s7948_s3 + $0x4e8] ss:$16 sps:$4 sm:$0xff]  }
 0x102   : > { %v5701_v27 = vld [vmem:[%s7948_s3 + $0x328] ss:$16 sps:$4 sm:$0xff]  }
 0x104   : > { %2215 = vmatpush1.bf16.msra.mxu1 %v5612_v28  ;;  %2137 = vmatpush1.bf16.msra.mxu0 %v5615_v29  ;;  %v5706_v28 = vld [vmem:[%s7948_s3 + $0x50c] ss:$16 sps:$4 sm:$0xff]  }
 0x105   : > { %2216 = vmatprep.subr.bf16.mxu1 %v5620_v30  ;;  %2138 = vmatprep.subr.bf16.mxu0 %v5623_v31  ;;  %v5709_v29 = vld [vmem:[%s7948_s3 + $0x34c] ss:$16 sps:$4 sm:$0xff]   ;;  %v5704_v30 = vld [vmem:[%s7948_s3 + $0x508] ss:$16 sps:$4 sm:$0xff]  }
 0x106   : > { %v5707_v31 = vld [vmem:[%s7948_s3 + $0x348] ss:$16 sps:$4 sm:$0xff]  }
 0x108   : > { %2217 = vmatpush1.bf16.msra.mxu1 %v5618_v32  ;;  %2139 = vmatpush1.bf16.msra.mxu0 %v5621_v35  ;;  %v5712_v32 = vld [vmem:[%s7948_s3 + $0x52c] ss:$16 sps:$4 sm:$0xff]  }
 0x109   : > { %2218 = vmatprep.subr.bf16.mxu1 %v5626_v36  ;;  %2140 = vmatprep.subr.bf16.mxu0 %v5629_v37  ;;  %v5715_v35 = vld [vmem:[%s7948_s3 + $0x36c] ss:$16 sps:$4 sm:$0xff]   ;;  %v5710_v36 = vld [vmem:[%s7948_s3 + $0x528] ss:$16 sps:$4 sm:$0xff]  }
 0x10a   : > { %v5713_v37 = vld [vmem:[%s7948_s3 + $0x368] ss:$16 sps:$4 sm:$0xff]  }
 0x10c   : > { %2219 = vmatpush1.bf16.msra.mxu1 %v5624_v38  ;;  %2141 = vmatpush1.bf16.msra.mxu0 %v5627_v39  ;;  %v5718_v38 = vld [vmem:[%s7948_s3 + $0x54c] ss:$16 sps:$4 sm:$0xff]  }
 0x10d   : > { %2220 = vmatprep.subr.bf16.mxu1 %v5632_v40  ;;  %2142 = vmatprep.subr.bf16.mxu0 %v5635_v43  ;;  %v5721_v39 = vld [vmem:[%s7948_s3 + $0x38c] ss:$16 sps:$4 sm:$0xff]   ;;  %v5716_v40 = vld [vmem:[%s7948_s3 + $0x548] ss:$16 sps:$4 sm:$0xff]  }
 0x10e   : > { %v5719_v43 = vld [vmem:[%s7948_s3 + $0x388] ss:$16 sps:$4 sm:$0xff]  }
 0x110   : > { %2221 = vmatpush1.bf16.msra.mxu1 %v5630_v44  ;;  %2143 = vmatpush1.bf16.msra.mxu0 %v5633_v46  ;;  %v5724_v44 = vld [vmem:[%s7948_s3 + $0x56c] ss:$16 sps:$4 sm:$0xff]  }
 0x111   : > { %2222 = vmatprep.subr.bf16.mxu1 %v5638_v47  ;;  %2144 = vmatprep.subr.bf16.mxu0 %v5641_v50  ;;  %v5727_v46 = vld [vmem:[%s7948_s3 + $0x3ac] ss:$16 sps:$4 sm:$0xff]   ;;  %v5722_v47 = vld [vmem:[%s7948_s3 + $0x568] ss:$16 sps:$4 sm:$0xff]  }
 0x112   : > { %v5725_v50 = vld [vmem:[%s7948_s3 + $0x3a8] ss:$16 sps:$4 sm:$0xff]  }
 0x114   : > { %2223 = vmatpush1.bf16.msra.mxu1 %v5636_v51  ;;  %2145 = vmatpush1.bf16.msra.mxu0 %v5639_v34  ;;  %v5730_v51 = vld [vmem:[%s7948_s3 + $0x58c] ss:$16 sps:$4 sm:$0xff]  }
 0x115   : > { %2224 = vmatprep.subr.bf16.mxu1 %v5646_v52  ;;  %2237 = vmatprep.subr.bf16.mxu0 %v5649_v54  ;;  %v5733_v34 = vld [vmem:[%s7948_s3 + $0x3cc] ss:$16 sps:$4 sm:$0xff]   ;;  %v5728_v52 = vld [vmem:[%s7948_s3 + $0x588] ss:$16 sps:$4 sm:$0xff]  }
 0x116   : > { %v5731_v54 = vld [vmem:[%s7948_s3 + $0x3c8] ss:$16 sps:$4 sm:$0xff]  }
 0x117   : > { %2147 = vmatmul.mubr.bf16.vlgmr.msra.gmra.mrb[8].mxu0 %v6710_v55 }
 0x118   : > { %2225 = vmatpush1.bf16.msra.mxu1 %v5644_v56  ;;  %2238 = vmatpush1.bf16.msra.mxu0 %v5647_v57  ;;  %v5736_v56 = vld [vmem:[%s7948_s3 + $0x5ac] ss:$16 sps:$4 sm:$0xff]  }
 0x119   : > { %2226 = vmatprep.subr.bf16.mxu1 %v5652_v58  ;;  %2239 = vmatprep.subr.bf16.mxu0 %v5655_v45  ;;  %v5739_v57 = vld [vmem:[%s7948_s3 + $0x3ec] ss:$16 sps:$4 sm:$0xff]   ;;  %v5734_v58 = vld [vmem:[%s7948_s3 + $0x5a8] ss:$16 sps:$4 sm:$0xff]  }
 0x11a   : > { %2269 = vmatprep.mubr.bf16.mxu0 %v6314_v42  ;;  %v5667_v42 = vld [vmem:[%s7948_s3 + $0x26c] ss:$16 sps:$4 sm:$0xff]   ;;  %v5737_v45 = vld [vmem:[%s7948_s3 + $0x3e8] ss:$16 sps:$4 sm:$0xff]  }
 0x11c   : > { %2227 = vmatpush1.bf16.msra.mxu1 %v5650_v59  ;;  %2240 = vmatpush1.bf16.msra.mxu0 %v5653_v60  ;;  %v5742_v59 = vld [vmem:[%s7948_s3 + $0x5cc] ss:$16 sps:$4 sm:$0xff]  }
 0x11d   : > { %2278 = vmatprep.subr.bf16.mxu1 %v5658_v61  ;;  %2241 = vmatprep.subr.bf16.mxu0 %v5661_v62  ;;  %v5745_v60 = vld [vmem:[%s7948_s3 + $0x60c] ss:$16 sps:$4 sm:$0xff]   ;;  %v5740_v61 = vld [vmem:[%s7948_s3 + $0x5c8] ss:$16 sps:$4 sm:$0xff]  }
 0x11e   : > { %v5743_v62 = vld [vmem:[%s7948_s3 + $0x608] ss:$16 sps:$4 sm:$0xff]  }
 0x11f   : > { %2229 = vmatmul.mubr.bf16.vlgmr.msra.gmra.mrb[12].mxu1 %v6508_v48  ;;  %v5673_v48 = vld [vmem:[%s7948_s3 + $0x28c] ss:$16 sps:$4 sm:$0xff]  }
 0x120   : > { %2279 = vmatpush1.bf16.msra.mxu1 %v5656_v63  ;;  %2242 = vmatpush1.bf16.msra.mxu0 %v5659_v0  ;;  %v5748_v63 = vld [vmem:[%s7948_s3 + $0x5ec] ss:$16 sps:$4 sm:$0xff]   ;;  %v2406_v0 = vld [vmem:[%s7951_s6 + $0x80] sm:$0xff] }
 0x121   : > { %2280 = vmatprep.subr.bf16.mxu1 %v5664_v1  ;;  %2243 = vmatprep.subr.bf16.mxu0 %v5667_v42  ;;  %v2407_v1 = vld [vmem:[%s7951_s6 + $0x88] sm:$0xff] }
 0x122   : > { %2310 = vmatprep.mubr.bf16.mxu1 %v6522_v33  ;;  %v5679_v33 = vld [vmem:[%s7948_s3 + $0x2ac] ss:$16 sps:$4 sm:$0xff]   ;;  %v5746_v42 = vld [vmem:[%s7948_s3 + $0x5e8] ss:$16 sps:$4 sm:$0xff]  }
 0x124   : > { %2281 = vmatpush1.bf16.msra.mxu1 %v5662_v3  ;;  %2244 = vmatpush1.bf16.msra.mxu0 %v5665_v41  ;;  %v5339_v3 = vpack.c.bf16 %v2407_v1, %v2406_v0  ;;  %v2390_v41 = vld [vmem:[%s7951_s6] sm:$0xff] }
 0x125   : > { %2282 = vmatprep.subr.bf16.mxu1 %v5670_v4  ;;  %2245 = vmatprep.subr.bf16.mxu0 %v5673_v48  ;;  %v2391_v4 = vld [vmem:[%s7951_s6 + $0x8] sm:$0xff]  ;;  %v2409_v48 = vld [vmem:[%s7951_s6 + $0x98] sm:$0xff] }
 0x128   : > { %2283 = vmatpush1.bf16.msra.mxu1 %v5668_v5  ;;  %2246 = vmatpush1.bf16.msra.mxu0 %v5671_v6  ;;  %v5341_v5 = vpack.c.bf16 %v2391_v4, %v2390_v41  ;;  %v2392_v6 = vld [vmem:[%s7951_s6 + $0x10] sm:$0xff] }
 0x129   : > { %2284 = vmatprep.subr.bf16.mxu1 %v5676_v7  ;;  %2247 = vmatprep.subr.bf16.mxu0 %v5679_v33  ;;  %v2393_v7 = vld [vmem:[%s7951_s6 + $0x18] sm:$0xff]  ;;  %v2410_v33 = vld [vmem:[%s7951_s6 + $0xa0] sm:$0xff] }
 0x12c   : > { %2285 = vmatpush1.bf16.msra.mxu1 %v5674_v8  ;;  %2248 = vmatpush1.bf16.msra.mxu0 %v5677_v9  ;;  %v2411_v8 = vld [vmem:[%s7951_s6 + $0xa8] sm:$0xff]  ;;  %v5345_v9 = vpack.c.bf16 %v2393_v7, %v2392_v6  ;;  %v7033_v6 = vshrl.u32 %v487_v22, 7 }
 0x12d   : > { %2286 = vmatprep.subr.bf16.mxu1 %v5682_v10  ;;  %2249 = vmatprep.subr.bf16.mxu0 %v5685_v12  ;;  %v5347_v10 = vpack.c.bf16 %v2411_v8, %v2410_v33  ;;  %v2394_v12 = vld [vmem:[%s7951_s6 + $0x20] sm:$0xff] }
 0x12e   : > { %v7036_v7 = vsub.s32 0, %v7033_v6  ;;  %v7041_v33 = vld [vmem:[%s7949_s4] sm:$0xf]  ;;  %v7044_v8 = vsub.s32 1, %v7033_v6 }
 0x130   : > { %2287 = vmatpush1.bf16.msra.mxu1 %v5680_v13  ;;  %2250 = vmatpush1.bf16.msra.mxu0 %v5683_v14  ;;  %v2395_v13 = vld [vmem:[%s7951_s6 + $0x28] sm:$0xff] }
 0x131   : > { %2288 = vmatprep.subr.bf16.mxu1 %v5688_v15  ;;  %2251 = vmatprep.subr.bf16.mxu0 %v5691_v16  ;;  %v5349_v14 = vpack.c.bf16 %v2395_v13, %v2394_v12  ;;  %v2396_v16 = vld [vmem:[%s7951_s6 + $0x30] sm:$0xff]  ;;  %v2365_v12 = vrot.slane %v7041_v33, %v7036_v7 }
 0x134   : > { %2289 = vmatpush1.bf16.msra.mxu1 %v5686_v17  ;;  %2252 = vmatpush1.bf16.msra.mxu0 %v5689_v18  ;;  %v2397_v17 = vld [vmem:[%s7951_s6 + $0x38] sm:$0xff] }
 0x135   : > { %2290 = vmatprep.subr.bf16.mxu1 %v5694_v19  ;;  %2253 = vmatprep.subr.bf16.mxu0 %v5697_v20  ;;  %v2414_v20 = vld [vmem:[%s7951_s6 + $0xc0] sm:$0xff] }
 0x138   : > { %2291 = vmatpush1.bf16.msra.mxu1 %v5692_v21  ;;  %2254 = vmatpush1.bf16.msra.mxu0 %v5695_v23  ;;  %v2415_v21 = vld [vmem:[%s7951_s6 + $0xc8] sm:$0xff] }
 0x139   : > { %2292 = vmatprep.subr.bf16.mxu1 %v5700_v24  ;;  %2255 = vmatprep.subr.bf16.mxu0 %v5703_v25  ;;  %v5353_v25 = vpack.c.bf16 %v2397_v17, %v2396_v16 }
 0x13c   : > { %2293 = vmatpush1.bf16.msra.mxu1 %v5698_v26  ;;  %2256 = vmatpush1.bf16.msra.mxu0 %v5701_v27  ;;  %v5355_v26 = vpack.c.bf16 %v2415_v21, %v2414_v20  ;;  %v2398_v27 = vld [vmem:[%s7951_s6 + $0x40] sm:$0xff]  ;;  %v2423_v20 = vld [vmem:[%s7951_s6 + $0x108] sm:$0xff] }
 0x13d   : > { %2294 = vmatprep.subr.bf16.mxu1 %v5706_v28  ;;  %2257 = vmatprep.subr.bf16.mxu0 %v5709_v29  ;;  %v2399_v28 = vld [vmem:[%s7951_s6 + $0x48] sm:$0xff]  ;;  %v2416_v29 = vld [vmem:[%s7951_s6 + $0xd0] sm:$0xff] }
 0x140   : > { %2295 = vmatpush1.bf16.msra.mxu1 %v5704_v30  ;;  %2258 = vmatpush1.bf16.msra.mxu0 %v5707_v31  ;;  %v2417_v30 = vld [vmem:[%s7951_s6 + $0xd8] sm:$0xff]  ;;  %v5357_v31 = vpack.c.bf16 %v2399_v28, %v2398_v27 }
 0x141   : > { %2296 = vmatprep.subr.bf16.mxu1 %v5712_v32  ;;  %2259 = vmatprep.subr.bf16.mxu0 %v5715_v35  ;;  %v5359_v32 = vpack.c.bf16 %v2417_v30, %v2416_v29  ;;  %v2400_v35 = vld [vmem:[%s7951_s6 + $0x50] sm:$0xff] }
 0x144   : > { %2297 = vmatpush1.bf16.msra.mxu1 %v5710_v36  ;;  %2260 = vmatpush1.bf16.msra.mxu0 %v5713_v37  ;;  %v2401_v36 = vld [vmem:[%s7951_s6 + $0x58] sm:$0xff]  ;;  %v2418_v37 = vld [vmem:[%s7951_s6 + $0xe0] sm:$0xff] }
 0x145   : > { %2298 = vmatprep.subr.bf16.mxu1 %v5718_v38  ;;  %2261 = vmatprep.subr.bf16.mxu0 %v5721_v39  ;;  %v2419_v38 = vld [vmem:[%s7951_s6 + $0xe8] sm:$0xff]  ;;  %v5361_v39 = vpack.c.bf16 %v2401_v36, %v2400_v35  ;;  %v2424_v35 = vld [vmem:[%s7951_s6 + $0x110] sm:$0xff]  ;;  %v2425_v36 = vld [vmem:[%s7951_s6 + $0x118] sm:$0xff] }
 0x148   : > { %2299 = vmatpush1.bf16.msra.mxu1 %v5716_v40  ;;  %2262 = vmatpush1.bf16.msra.mxu0 %v5719_v43  ;;  %v5363_v40 = vpack.c.bf16 %v2419_v38, %v2418_v37  ;;  %v2402_v43 = vld [vmem:[%s7951_s6 + $0x60] sm:$0xff] }
 0x149   : > { %2300 = vmatprep.subr.bf16.mxu1 %v5724_v44  ;;  %2263 = vmatprep.subr.bf16.mxu0 %v5727_v46  ;;  %v2403_v44 = vld [vmem:[%s7951_s6 + $0x68] sm:$0xff]  ;;  %v2420_v46 = vld [vmem:[%s7951_s6 + $0xf0] sm:$0xff] }
 0x14c   : > { %2301 = vmatpush1.bf16.msra.mxu1 %v5722_v47  ;;  %2264 = vmatpush1.bf16.msra.mxu0 %v5725_v50  ;;  %v2421_v47 = vld [vmem:[%s7951_s6 + $0xf8] sm:$0xff]  ;;  %v5365_v50 = vpack.c.bf16 %v2403_v44, %v2402_v43  ;;  %v5377_v43 = vpack.c.bf16 %v2425_v36, %v2424_v35 }
 0x14d   : > { %2302 = vmatprep.subr.bf16.mxu1 %v5730_v51  ;;  %2265 = vmatprep.subr.bf16.mxu0 %v5733_v34  ;;  %v5367_v51 = vpack.c.bf16 %v2421_v47, %v2420_v46  ;;  %v2404_v34 = vld [vmem:[%s7951_s6 + $0x70] sm:$0xff]  ;;  %v2427_v46 = vld [vmem:[%s7951_s6 + $0x128] sm:$0xff] }
 0x14e   : > { %v2444_v47 = vld [vmem:[%s7951_s6 + $0x1b0] sm:$0xff] }
 0x150   : > { %2303 = vmatpush1.bf16.msra.mxu1 %v5728_v52  ;;  %2266 = vmatpush1.bf16.msra.mxu0 %v5731_v54  ;;  %v2405_v52 = vld [vmem:[%s7951_s6 + $0x78] sm:$0xff]  ;;  %v2438_v54 = vld [vmem:[%s7951_s6 + $0x180] sm:$0xff] }
 0x151   : > { %2304 = vmatprep.subr.bf16.mxu1 %v5736_v56  ;;  %2267 = vmatprep.subr.bf16.mxu0 %v5739_v57  ;;  %v2439_v56 = vld [vmem:[%s7951_s6 + $0x188] sm:$0xff]  ;;  %v5369_v57 = vpack.c.bf16 %v2405_v52, %v2404_v34  ;;  %v2428_v52 = vld [vmem:[%s7951_s6 + $0x130] sm:$0xff] }
 0x154   : > { %2305 = vmatpush1.bf16.msra.mxu1 %v5734_v58  ;;  %2268 = vmatpush1.bf16.msra.mxu0 %v5737_v45  ;;  %v5371_v58 = vpack.c.bf16 %v2439_v56, %v2438_v54  ;;  %v2429_v54 = vld [vmem:[%s7951_s6 + $0x138] sm:$0xff]  ;;  %v2446_v56 = vld [vmem:[%s7951_s6 + $0x1c0] sm:$0xff] }
 0x155   : > { %2306 = vmatprep.subr.bf16.mxu1 %v5742_v59  ;;  %2319 = vmatprep.subr.bf16.mxu0 %v5745_v60 }
 0x157   : > { %2270 = vmatmul.mubr.bf16.vlgmr.msra.gmra.mrb[12].mxu0 %v6512_v49  ;;  %v2408_v49 = vld [vmem:[%s7951_s6 + $0x90] sm:$0xff] }
 0x158   : > { %2307 = vmatpush1.bf16.msra.mxu1 %v5740_v61  ;;  %2320 = vmatpush1.bf16.msra.mxu0 %v5743_v62 }
 0x159   : > { %2308 = vmatprep.subr.bf16.mxu1 %v5748_v63  ;;  %2351 = vmatprep.mubr.bf16.mxu0 %v6107_v2  ;;  %v5343_v2 = vpack.c.bf16 %v2409_v48, %v2408_v49 }
 0x15c   : > { %2309 = vmatpush1.bf16.msra.mxu1 %v5746_v42 }
 0x15d   : > { %5340 = vmatprep.subr.bf16.mxu1 %v5339_v3 }
 0x15f   : > { %2311 = vmatmul.mubr.bf16.vlgmr.msra.gmra.mrb[16].mxu1 %v6710_v55  ;;  %4967 = vmatmul.mubr.msk.bf16.vlgmr.msra.gmra.mrb[16].mxu0 %vm2028_vm5, %v6534_v53  ;;  %v2412_v55 = vld [vmem:[%s7951_s6 + $0xb0] sm:$0xff]  ;;  %v2413_v53 = vld [vmem:[%s7951_s6 + $0xb8] sm:$0xff] }
 0x160   : > { %5342 = vmatpush3.bf16.msra.mxu1 %v5341_v5  ;;  %2704 = vmatprep.mubr.f32.mxu0 %v6109_v11  ;;  %v5351_v15 = vpack.c.bf16 %v2413_v53, %v2412_v55  ;;  %v2369_v53 = vrot.slane %v7041_v33, %v7044_v8 }
 0x161   : > { %5344 = vmatprep.subr.bf16.mxu1 %v5343_v2 }
 0x164   : > { %5346 = vmatpush3.bf16.msra.mxu1 %v5345_v9 }
 0x165   : > { %5348 = vmatprep.subr.bf16.mxu1 %v5347_v10 }
 0x166   : > { %v606_v18 = vpop.f32.mrb[0].mxu0  ;;  %v6974_v19 = vpop.f32.mrb[0].mxu1 }
 0x167   : > { %v608_v23 = vpop.f32.mrb[1].mxu0  ;;  %v6982_v24 = vpop.f32.mrb[1].mxu1 }
 0x168   : > { %5350 = vmatpush3.bf16.msra.mxu1 %v5349_v14 }
 0x169   : > { %5352 = vmatprep.subr.bf16.mxu1 %v5351_v15 }
 0x16c   : > { %5354 = vmatpush3.bf16.msra.mxu1 %v5353_v25  ;;  %v2441_v25 = vld [vmem:[%s7951_s6 + $0x198] sm:$0xff] }
 0x16d   : > { %5356 = vmatprep.subr.bf16.mxu1 %v5355_v26 }
 0x170   : > { %5358 = vmatpush3.bf16.msra.mxu1 %v5357_v31 }
 0x171   : > { %5360 = vmatprep.subr.bf16.mxu1 %v5359_v32 }
 0x174   : > { %5362 = vmatpush3.bf16.msra.mxu1 %v5361_v39  ;;  %v2442_v39 = vld [vmem:[%s7951_s6 + $0x1a0] sm:$0xff] }
 0x175   : > { %5364 = vmatprep.subr.bf16.mxu1 %v5363_v40 }
 0x178   : > { %5366 = vmatpush3.bf16.msra.mxu1 %v5365_v50  ;;  %v2445_v50 = vld [vmem:[%s7951_s6 + $0x1b8] sm:$0xff] }
 0x179   : > { %5368 = vmatprep.subr.bf16.mxu1 %v5367_v51  ;;  %v5383_v34 = vpack.c.bf16 %v2445_v50, %v2444_v47  ;;  %v2615_v50 = vld [vmem:[%s7953_s8 + $0x20] sm:$0xff] }
 0x17c   : > { %5370 = vmatpush3.bf16.msra.mxu1 %v5369_v57  ;;  %v2447_v57 = vld [vmem:[%s7951_s6 + $0x1c8] sm:$0xff] }
 0x17d   : > { %5372 = vmatprep.subr.bf16.mxu1 %v5371_v58  ;;  %v5385_v58 = vpack.c.bf16 %v2429_v54, %v2428_v52  ;;  %v2613_v54 = vld [vmem:[%s7953_s8 + $0x10] sm:$0xff] }
 0x1aa   : > { %v2066_v45 = vpop.f32.mrb[4].mxu0  ;;  %v2107_v59 = vpop.f32.mrb[4].mxu1 }
 0x1ab   : > { %v2067_v60 = vadd.f32 %v2066_v45, %v606_v18  ;;  %v2068_v61 = vpop.f32.mrb[5].mxu0  ;;  %v2109_v62 = vpop.f32.mrb[5].mxu1  ;;  %v2422_v18 = vld [vmem:[%s7951_s6 + $0x100] sm:$0xff]  ;;  %v5387_v45 = vpack.c.bf16 %v2447_v57, %v2446_v56  ;;  %v2617_v56 = vld [vmem:[%s7953_s8 + $0x30] sm:$0xff] }
 0x1ac   : > { %v2069_v63 = vadd.f32 %v2068_v61, %v608_v23  ;;  %v2070_v0 = vpop.f32.mrb[6].mxu0  ;;  %v2111_v1 = vpop.f32.mrb[6].mxu1  ;;  %v2440_v23 = vld [vmem:[%s7951_s6 + $0x190] sm:$0xff]  ;;  %v5373_v28 = vpack.c.bf16 %v2423_v20, %v2422_v18  ;;  %v7146_v20 = vsub.s32 2, %v7033_v6  ;;  %v5409_v57 = vpack.c.bf16 %v2617_v56, %v2613_v54  ;;  %v5805_v54 = vld [vmem:[%s7955_s10 + $0x1fc] ss:$28 sps:$4 sm:$0xff]  }
 0x1ad   : > { %v2108_v42 = vadd.f32 %v2107_v59, %v2067_v60  ;;  %v2071_v3 = vpop.f32.mrb[7].mxu0  ;;  %v2112_v41 = vpop.f32.mrb[7].mxu1  ;;  %v5375_v32 = vpack.c.bf16 %v2441_v25, %v2440_v23  ;;  %v2430_v59 = vld [vmem:[%s7951_s6 + $0x140] sm:$0xff]  ;;  %v2431_v60 = vld [vmem:[%s7951_s6 + $0x148] sm:$0xff]  ;;  %v2448_v61 = vld [vmem:[%s7951_s6 + $0x1d0] sm:$0xff] }
 0x1ae   : > { %v2110_v4 = vadd.f32 %v2109_v62, %v2069_v63  ;;  %v2449_v62 = vld [vmem:[%s7951_s6 + $0x1d8] sm:$0xff]  ;;  %v5389_v63 = vpack.c.bf16 %v2431_v60, %v2430_v59  ;;  %v2432_v1 = vld [vmem:[%s7951_s6 + $0x150] sm:$0xff]  ;;  %v2450_v3 = vld [vmem:[%s7951_s6 + $0x1e0] sm:$0xff] }
 0x1af   : > { %v5391_v0 = vpack.c.bf16 %v2449_v62, %v2448_v61  ;;  %v2451_v41 = vld [vmem:[%s7951_s6 + $0x1e8] sm:$0xff]  ;;  %v4968_v60 = vld [vmem:[%s7952_s7] ss:$0 sm:$0xff] }
 0x1b0   : > { %v5808_v56 = vld [vmem:[%s7955_s10 + $0x204] ss:$28 sps:$4 sm:$0xff]  }
 0x1b2   : > { %v2189_v49 = vpop.f32.mrb[8].mxu1 }
 0x1b3   : > { %v2191_v48 = vpop.f32.mrb[9].mxu1 }
 0x1b4   : > { %v2193_v5 = vpop.f32.mrb[10].mxu1 }
 0x1b5   : > { %v2194_v2 = vpop.f32.mrb[11].mxu1  ;;  %v2435_v5 = vld [vmem:[%s7951_s6 + $0x168] sm:$0xff] }
 0x1b6   : > { %v2452_v2 = vld [vmem:[%s7951_s6 + $0x1f0] sm:$0xff] }
 0x1ea   : > { %v2148_v9 = vpop.f32.mrb[8].mxu0 }
 0x1eb   : > { %v2149_v10 = vadd.f32 %v2148_v9, %v2108_v42  ;;  %v2150_v13 = vpop.f32.mrb[9].mxu0  ;;  %v2433_v42 = vld [vmem:[%s7951_s6 + $0x158] sm:$0xff] }
 0x1ec   : > { %v2151_v55 = vadd.f32 %v2150_v13, %v2110_v4  ;;  %v2152_v22 = vpop.f32.mrb[10].mxu0  ;;  %v5393_v4 = vpack.c.bf16 %v2433_v42, %v2432_v1  ;;  %v2453_v9 = vld [vmem:[%s7951_s6 + $0x1f8] sm:$0xff]  ;;  %v2436_v13 = vld [vmem:[%s7951_s6 + $0x170] sm:$0xff] }
 0x1ed   : > { %v2190_v14 = vadd.f32 %v2189_v49, %v2149_v10  ;;  %v2153_v15 = vpop.f32.mrb[11].mxu0  ;;  %v5395_v49 = vpack.c.bf16 %v2451_v41, %v2450_v3  ;;  %v2620_v41 = vld [vmem:[%s7953_s8 + $0x48] sm:$0xf] }
 0x1ee   : > { %v2192_v16 = vadd.f32 %v2191_v48, %v2151_v55  ;;  %v2434_v48 = vld [vmem:[%s7951_s6 + $0x160] sm:$0xff]  ;;  %v2437_v55 = vld [vmem:[%s7951_s6 + $0x178] sm:$0xff] }
 0x1ef   : > { %v2382_v17 = vadd.f32 %v2365_v12, %v2190_v14  ;;  %v5397_v10 = vpack.c.bf16 %v2435_v5, %v2434_v48  ;;  %v5399_v12 = vpack.c.bf16 %v2453_v9, %v2452_v2  ;;  %v5401_v22 = vpack.c.bf16 %v2437_v55, %v2436_v13  ;;  %v2621_v48 = vld [vmem:[%s7953_s8 + $0x50] sm:$0xf]  ;;  %v5751_v5 = vld [vmem:[%s7955_s10 + $0x4] ss:$28 sps:$4 sm:$0xff]   ;;  %v5754_v2 = vld [vmem:[%s7955_s10 + $0xc] ss:$28 sps:$4 sm:$0xff]  }
 0x1f0   : > { %v2383_v21 = vadd.f32 %v2369_v53, %v2192_v16  ;;  %v5749_v55 = vld [vmem:[%s7955_s10] ss:$28 sps:$4 sm:$0xff]  }
 0x1f1   : > { %v2386_v29 = vmax.f32 %v2382_v17, 0.0 }
 0x1f2   : > { %v2230_v26 = vpop.f32.mrb[12].mxu1  ;;  %v2387_v27 = vmax.f32 %v2383_v21, 0.0  ;;  %v7149_v21 = vsub.s32 3, %v7033_v6 }
 0x1f3   : > { %v7063_v30 = vadd.f32 %v2230_v26, %v6974_v19  ;;  %v2232_v31 = vpop.f32.mrb[13].mxu1  ;;  %v2443_v19 = vld [vmem:[%s7951_s6 + $0x1a8] sm:$0xff] }
 0x1f4   : > { %v2233_v37 = vadd.f32 %v2232_v31, %v6982_v24  ;;  %v2234_v38 = vpop.f32.mrb[14].mxu1  ;;  %2525 = vmatprep.mubr.f32.mxu1 %v2387_v27  ;;  %v5379_v44 = vpack.c.bf16 %v2443_v19, %v2442_v39  ;;  %v2426_v24 = vld [vmem:[%s7951_s6 + $0x120] sm:$0xff] }
 0x1f5   : > { %v2235_v40 = vpop.f32.mrb[15].mxu1  ;;  %2526 = vmatmul.mubr.f32.vlgmr.msra.gmra.mrb[20].mxu1 %v2386_v29  ;;  %v5381_v51 = vpack.c.bf16 %v2427_v46, %v2426_v24  ;;  %v2612_v24 = vld [vmem:[%s7953_s8 + $0x8] sm:$0xff]  ;;  %v2611_v46 = vld [vmem:[%s7953_s8] sm:$0xff] }
 0x1f6   : > { %5374 = vmatpush3.bf16.msra.mxu1 %v5373_v28  ;;  %v2373_v28 = vrot.slane %v7041_v33, %v7146_v20 }
 0x1f7   : > { %5376 = vmatprep.subr.bf16.mxu1 %v5375_v32  ;;  %v2377_v32 = vrot.slane %v7041_v33, %v7149_v21  ;;  %v2616_v33 = vld [vmem:[%s7953_s8 + $0x28] sm:$0xff] }
 0x1f8   : > { %v5403_v47 = vpack.c.bf16 %v2616_v33, %v2612_v24  ;;  %v5788_v24 = vld [vmem:[%s7955_s10 + $0x158] ss:$28 sps:$4 sm:$0xff]   ;;  %v5793_v33 = vld [vmem:[%s7955_s10 + $0x18c] ss:$28 sps:$4 sm:$0xff]  }
 0x1fa   : > { %5378 = vmatpush3.bf16.msra.mxu1 %v5377_v43  ;;  %5404 = vmatprep.subr.bf16.mxu0 %v5403_v47  ;;  %v5791_v47 = vld [vmem:[%s7955_s10 + $0x188] ss:$28 sps:$4 sm:$0xff]  }
 0x1fb   : > { %5380 = vmatprep.subr.bf16.mxu1 %v5379_v44 }
 0x1fe   : > { %5382 = vmatpush3.bf16.msra.mxu1 %v5381_v51  ;;  %v2618_v51 = vld [vmem:[%s7953_s8 + $0x38] sm:$0xff] }
 0x1ff   : > { %5384 = vmatprep.subr.bf16.mxu1 %v5383_v34  ;;  %v5405_v34 = vpack.c.bf16 %v2615_v50, %v2611_v46  ;;  %v5796_v46 = vld [vmem:[%s7955_s10 + $0x194] ss:$28 sps:$4 sm:$0xff]  }
 0x200   : > { %v5794_v50 = vld [vmem:[%s7955_s10 + $0x190] ss:$28 sps:$4 sm:$0xff]  }
 0x201   : > { %5406 = vmatpush1.bf16.msra.mxu0 %v5405_v34  ;;  %v5797_v34 = vld [vmem:[%s7955_s10 + $0x1c0] ss:$28 sps:$4 sm:$0xff]  }
 0x202   : > { %5386 = vmatpush3.bf16.msra.mxu1 %v5385_v58  ;;  %4969 = vmatprep.subr.msk.mxu0 %vm2627_vm7, %v2620_v41  ;;  %v5821_v41 = vld [vmem:[%s7955_s10 + $0x2a0] ss:$28 sps:$4 sm:$0xff]  }
 0x203   : > { %5388 = vmatprep.subr.bf16.mxu1 %v5387_v45 }
 0x206   : > { %5390 = vmatpush3.bf16.msra.mxu1 %v5389_v63 }
 0x207   : > { %5392 = vmatprep.subr.bf16.mxu1 %v5391_v0 }
 0x20a   : > { %5394 = vmatpush3.bf16.msra.mxu1 %v5393_v4  ;;  %v2622_v4 = vld [vmem:[%s7953_s8 + $0x58] sm:$0xf] }
 0x20b   : > { %5396 = vmatprep.subr.bf16.mxu1 %v5395_v49  ;;  %v2619_v49 = vld [vmem:[%s7953_s8 + $0x40] sm:$0xf] }
 0x20c   : > { %4970 = vmatpush1.msk.msra.mxu0 %vm2627_vm7, %v2619_v49  ;;  %v5829_v49 = vld [vmem:[%s7955_s10 + $0x2dc] ss:$28 sps:$4 sm:$0xff]  }
 0x20d   : > { %4261 = vmatprep.subr.bf16.mxu0 %v5751_v5  ;;  %v5827_v5 = vld [vmem:[%s7955_s10 + $0x2d8] ss:$28 sps:$4 sm:$0xff]  }
 0x20e   : > { %5398 = vmatpush3.bf16.msra.mxu1 %v5397_v10  ;;  %v2601_v10 = vld [vmem:[%s476_s29] sm:$0xff] }
 0x20f   : > { %5400 = vmatprep.subr.bf16.mxu1 %v5399_v12 }
 0x212   : > { %5402 = vmatpush3.bf16.msra.mxu1 %v5401_v22  ;;  %v5752_v22 = vld [vmem:[%s7955_s10 + $0x8] ss:$28 sps:$4 sm:$0xff]  }
 0x22a   : > { %v2271_v53 = vpop.f32.mrb[12].mxu0 }
 0x22b   : > { %v2272_v14 = vadd.f32 %v2271_v53, %v7063_v30  ;;  %v2273_v15 = vpop.f32.mrb[13].mxu0 }
 0x22c   : > { %v2274_v16 = vadd.f32 %v2273_v15, %v2233_v37  ;;  %v2275_v17 = vpop.f32.mrb[14].mxu0  ;;  %v5760_v15 = vld [vmem:[%s7955_s10 + $0x44] ss:$28 sps:$4 sm:$0xff]  }
 0x22d   : > { %v2276_v18 = vpop.f32.mrb[15].mxu0  ;;  %v5758_v17 = vld [vmem:[%s7955_s10 + $0x40] ss:$28 sps:$4 sm:$0xff]  }
 0x22e   : > { %v5763_v18 = vld [vmem:[%s7955_s10 + $0x74] ss:$28 sps:$4 sm:$0xff]  }
 0x232   : > { %v2312_v23 = vpop.f32.mrb[16].mxu1  ;;  %v2353_v25 = vpop.f32.mrb[16].mxu0 }
 0x233   : > { %v2313_v26 = vadd.f32 %v2312_v23, %v2272_v14  ;;  %v2314_v27 = vpop.f32.mrb[17].mxu1  ;;  %v2355_v29 = vpop.f32.mrb[17].mxu0  ;;  %v5757_v14 = vld [vmem:[%s7955_s10 + $0x3c] ss:$28 sps:$4 sm:$0xff]  }
 0x234   : > { %v2315_v31 = vadd.f32 %v2314_v27, %v2274_v16  ;;  %v2316_v30 = vpop.f32.mrb[18].mxu1  ;;  %v2357_v35 = vpop.f32.mrb[18].mxu0  ;;  %v5755_v16 = vld [vmem:[%s7955_s10 + $0x38] ss:$28 sps:$4 sm:$0xff]   ;;  %v5769_v27 = vld [vmem:[%s7955_s10 + $0xac] ss:$28 sps:$4 sm:$0xff]  }
 0x235   : > { %v2354_v36 = vadd.f32 %v2353_v25, %v2313_v26  ;;  %v2317_v37 = vpop.f32.mrb[19].mxu1  ;;  %v2358_v38 = vpop.f32.mrb[19].mxu0  ;;  %v5766_v23 = vld [vmem:[%s7955_s10 + $0x7c] ss:$28 sps:$4 sm:$0xff]   ;;  %v5761_v25 = vld [vmem:[%s7955_s10 + $0x70] ss:$28 sps:$4 sm:$0xff]  }
 0x236   : > { %v2356_v39 = vadd.f32 %v2355_v29, %v2315_v31  ;;  %v5764_v26 = vld [vmem:[%s7955_s10 + $0x78] ss:$28 sps:$4 sm:$0xff]   ;;  %v5767_v29 = vld [vmem:[%s7955_s10 + $0xa8] ss:$28 sps:$4 sm:$0xff]   ;;  %v5770_v31 = vld [vmem:[%s7955_s10 + $0xb0] ss:$28 sps:$4 sm:$0xff]  }
 0x237   : > { %v2384_v19 = vadd.f32 %v2373_v28, %v2354_v36  ;;  %v5772_v28 = vld [vmem:[%s7955_s10 + $0xb4] ss:$28 sps:$4 sm:$0xff]   ;;  %v5775_v30 = vld [vmem:[%s7955_s10 + $0xe4] ss:$28 sps:$4 sm:$0xff]   ;;  %v5781_v37 = vld [vmem:[%s7955_s10 + $0x11c] ss:$28 sps:$4 sm:$0xff]  }
 0x238   : > { %v2385_v40 = vadd.f32 %v2377_v32, %v2356_v39  ;;  %v5778_v32 = vld [vmem:[%s7955_s10 + $0xec] ss:$28 sps:$4 sm:$0xff]   ;;  %v5773_v35 = vld [vmem:[%s7955_s10 + $0xe0] ss:$28 sps:$4 sm:$0xff]   ;;  %v5779_v39 = vld [vmem:[%s7955_s10 + $0x118] ss:$28 sps:$4 sm:$0xff]  }
 0x239   : > { %v2388_v44 = vmax.f32 %v2384_v19, 0.0  ;;  %v5776_v36 = vld [vmem:[%s7955_s10 + $0xe8] ss:$28 sps:$4 sm:$0xff]   ;;  %v5782_v19 = vld [vmem:[%s7955_s10 + $0x120] ss:$28 sps:$4 sm:$0xff]  }
 0x23a   : > { %v2389_v43 = vmax.f32 %v2385_v40, 0.0  ;;  %v5784_v38 = vld [vmem:[%s7955_s10 + $0x124] ss:$28 sps:$4 sm:$0xff]   ;;  %v5787_v40 = vld [vmem:[%s7955_s10 + $0x154] ss:$28 sps:$4 sm:$0xff]  }
 0x23c   : > { %2595 = vmatprep.mubr.f32.mxu1 %v2389_v43  ;;  %v5790_v43 = vld [vmem:[%s7955_s10 + $0x15c] ss:$28 sps:$4 sm:$0xff]  }
 0x23d   : > { %2596 = vmatmul.mubr.f32.vlgmr.msra.gmra.mrb[22].mxu1 %v2388_v44  ;;  %v5785_v44 = vld [vmem:[%s7955_s10 + $0x150] ss:$28 sps:$4 sm:$0xff]  }
 0x23e   : > { %2775 = vmatprep.mubr.f32.mxu1 %v6109_v11  ;;  %v2614_v11 = vld [vmem:[%s7953_s8 + $0x18] sm:$0xff] }
 0x23f   : > { %v5407_v52 = vpack.c.bf16 %v2618_v51, %v2614_v11  ;;  %v5799_v11 = vld [vmem:[%s7955_s10 + $0x1c4] ss:$28 sps:$4 sm:$0xff]   ;;  %v5802_v51 = vld [vmem:[%s7955_s10 + $0x1cc] ss:$28 sps:$4 sm:$0xff]  }
 0x241   : > { %5408 = vmatprep.subr.bf16.mxu1 %v5407_v52  ;;  %v5800_v52 = vld [vmem:[%s7955_s10 + $0x1c8] ss:$28 sps:$4 sm:$0xff]  }
 0x242   : > { %5410 = vmatpush1.bf16.msra.mxu1 %v5409_v57  ;;  %v5803_v57 = vld [vmem:[%s7955_s10 + $0x1f8] ss:$28 sps:$4 sm:$0xff]  }
 0x243   : > { %4972 = vmatprep.subr.msk.mxu1 %vm2627_vm7, %v2622_v4  ;;  %v5824_v4 = vld [vmem:[%s7955_s10 + $0x2a8] ss:$28 sps:$4 sm:$0xff]  }
 0x246   : > { %4973 = vmatpush1.msk.msra.mxu1 %vm2627_vm7, %v2621_v48  ;;  %v5832_v48 = vld [vmem:[%s7955_s10 + $0x2e4] ss:$28 sps:$4 sm:$0xff]  }
 0x247   : > { %4343 = vmatprep.subr.bf16.mxu1 %v5754_v2  ;;  %v5830_v2 = vld [vmem:[%s7955_s10 + $0x2e0] ss:$28 sps:$4 sm:$0xff]  }
 0x2c8   : > { %v5233_v58 = vpop.f32.mrb[20].mxu1 }
 0x2c9   : > { %v5234_v45 = vpop.f32.mrb[21].mxu1 }
 0x2ca   : > { %v5235_v59 = vadd.f32 %v5234_v45, %v5233_v58  ;;  %v5806_v58 = vld [vmem:[%s7955_s10 + $0x200] ss:$28 sps:$4 sm:$0xff]   ;;  %v5811_v45 = vld [vmem:[%s7955_s10 + $0x234] ss:$28 sps:$4 sm:$0xff]  }
 0x2cc   : > { %v2528_v63 = vadd.f32 %v5235_v59, %v4968_v60  ;;  %v5814_v59 = vld [vmem:[%s7955_s10 + $0x23c] ss:$28 sps:$4 sm:$0xff]   ;;  %v5809_v60 = vld [vmem:[%s7955_s10 + $0x230] ss:$28 sps:$4 sm:$0xff]  }
 0x310   : > { %v5268_v61 = vpop.f32.mrb[22].mxu1 }
 0x311   : > { %v5269_v62 = vpop.f32.mrb[23].mxu1 }
 0x312   : > { %v5270_v0 = vadd.f32 %v5269_v62, %v5268_v61  ;;  %v5812_v61 = vld [vmem:[%s7955_s10 + $0x238] ss:$28 sps:$4 sm:$0xff]   ;;  %v5817_v62 = vld [vmem:[%s7955_s10 + $0x26c] ss:$28 sps:$4 sm:$0xff]  }
 0x314   : > { %v2598_v1 = vadd.f32 %v5270_v0, %v2528_v63  ;;  %v5820_v63 = vld [vmem:[%s7955_s10 + $0x274] ss:$28 sps:$4 sm:$0xff]   ;;  %v5815_v0 = vld [vmem:[%s7955_s10 + $0x268] ss:$28 sps:$4 sm:$0xff]  }
 0x316   : > { %v2602_v42 = vmul.f32 0.5, %v2598_v1  ;;  %4630 = vst.msk [vmem:[%s485_s15] sm:$0xff] %vm4629_vm6, %v2598_v1 }
 0x318   : > { %v2603_v3 = vmul.f32 1.442695, %v2602_v42  ;;  %v5823_v42 = vld [vmem:[%s7955_s10 + $0x2a4] ss:$28 sps:$4 sm:$0xff]  }
 0x31a   : > { %6069 = vpow2.f32 %v2603_v3  ;;  %v5826_v3 = vld [vmem:[%s7955_s10 + $0x2ac] ss:$28 sps:$4 sm:$0xff]  }
 0x324   : > { %v6070_v9 = vpop.eup %6069 }
 0x325   : > { %2606 = vrot.lane.b32.xlu0 %v6070_v9, %s6110_s14  ;;  %v5835_v9 = vld [vmem:[%s7955_s10 + $0x314] ss:$28 sps:$4 sm:$0xff]  }
 0x397   : > { %v2607_v12 = vpop.permute.xlu0 %2606 }
 0x398   : > { %v2609_v13 = vmul.f32 %v2607_v12, %v2601_v10  ;;  %v5838_v10 = vld [vmem:[%s7955_s10 + $0x31c] ss:$28 sps:$4 sm:$0xff]   ;;  %v5833_v12 = vld [vmem:[%s7955_s10 + $0x310] ss:$28 sps:$4 sm:$0xff]  }
 0x39a   : > { %v2610_v53 = vadd.f32 %v2609_v13, %v2598_v1  ;;  %v5818_v1 = vld [vmem:[%s7955_s10 + $0x270] ss:$28 sps:$4 sm:$0xff]   ;;  %v5836_v13 = vld [vmem:[%s7955_s10 + $0x318] ss:$28 sps:$4 sm:$0xff]  }
 0x39c   : > { %4971 = vmatmul.mubr.msk.f32.vlgmr.msra.gmra.mrb[2].mxu0 %vm2623_vm8, %v2610_v53  ;;  %4974 = vmatmul.mubr.msk.f32.vlgmr.msra.gmra.mrb[2].mxu1 %vm2623_vm8, %v2610_v53  ;;  %v5839_v53 = vld [vmem:[%s7955_s10 + $0x348] ss:$28 sps:$4 sm:$0xff]  }
 0x39d   : > { %4262 = vmatpush1.bf16.msra.mxu0 %v5749_v55  ;;  %4344 = vmatpush1.bf16.msra.mxu1 %v5752_v22  ;;  %v5841_v55 = vld [vmem:[%s7955_s10 + $0x34c] ss:$28 sps:$4 sm:$0xff]   ;;  %v5844_v22 = vld [vmem:[%s7955_s10 + $0x354] ss:$28 sps:$4 sm:$0xff]  }
 0x39e   : > { %4263 = vmatprep.subr.bf16.mxu0 %v5757_v14  ;;  %4345 = vmatprep.subr.bf16.mxu1 %v5760_v15  ;;  %v5842_v14 = vld [vmem:[%s7955_s10 + $0x350] ss:$28 sps:$4 sm:$0xff]   ;;  %v5847_v15 = vld [vmem:[%s7955_s10 + $0x384] ss:$28 sps:$4 sm:$0xff]  }
 0x3a1   : > { %4264 = vmatpush1.bf16.msra.mxu0 %v5755_v16  ;;  %4346 = vmatpush1.bf16.msra.mxu1 %v5758_v17  ;;  %v5850_v16 = vld [vmem:[%s7955_s10 + $0x38c] ss:$28 sps:$4 sm:$0xff]   ;;  %v2782_v17 = vld [vmem:[%s7954_s9] sm:$0xf] }
 0x3a2   : > { %4265 = vmatprep.subr.bf16.mxu0 %v5763_v18  ;;  %4347 = vmatprep.subr.bf16.mxu1 %v5766_v23  ;;  %v2787_v18 = vrot.slane %v2782_v17, %v7036_v7  ;;  %v2795_v23 = vrot.slane %v2782_v17, %v7146_v20 }
 0x3a5   : > { %4266 = vmatpush1.bf16.msra.mxu0 %v5761_v25  ;;  %4348 = vmatpush1.bf16.msra.mxu1 %v5764_v26  ;;  %v2791_v25 = vrot.slane %v2782_v17, %v7044_v8  ;;  %v2799_v26 = vrot.slane %v2782_v17, %v7149_v21  ;;  %v5905_v17 = vld [vmem:[%s7955_s10 + $0x5b0] ss:$28 sps:$4 sm:$0xff]  }
 0x3a6   : > { %4267 = vmatprep.subr.bf16.mxu0 %v5769_v27  ;;  %4349 = vmatprep.subr.bf16.mxu1 %v5772_v28 }
 0x3a9   : > { %4268 = vmatpush1.bf16.msra.mxu0 %v5767_v29  ;;  %4350 = vmatpush1.bf16.msra.mxu1 %v5770_v31 }
 0x3aa   : > { %4269 = vmatprep.subr.bf16.mxu0 %v5775_v30  ;;  %4351 = vmatprep.subr.bf16.mxu1 %v5778_v32 }
 0x3ad   : > { %4270 = vmatpush1.bf16.msra.mxu0 %v5773_v35  ;;  %4352 = vmatpush1.bf16.msra.mxu1 %v5776_v36 }
 0x3ae   : > { %4271 = vmatprep.subr.bf16.mxu0 %v5781_v37  ;;  %4353 = vmatprep.subr.bf16.mxu1 %v5784_v38 }
 0x3b1   : > { %4272 = vmatpush1.bf16.msra.mxu0 %v5779_v39  ;;  %4354 = vmatpush1.bf16.msra.mxu1 %v5782_v19 }
 0x3b2   : > { %4273 = vmatprep.subr.bf16.mxu0 %v5787_v40  ;;  %4355 = vmatprep.subr.bf16.mxu1 %v5790_v43  ;;  %v5845_v40 = vld [vmem:[%s7955_s10 + $0x380] ss:$28 sps:$4 sm:$0xff]   ;;  %v5848_v43 = vld [vmem:[%s7955_s10 + $0x388] ss:$28 sps:$4 sm:$0xff]  }
 0x3b5   : > { %4274 = vmatpush1.bf16.msra.mxu0 %v5785_v44  ;;  %4356 = vmatpush1.bf16.msra.mxu1 %v5788_v24  ;;  %v5853_v24 = vld [vmem:[%s7955_s10 + $0x3bc] ss:$28 sps:$4 sm:$0xff]  }
 0x3b6   : > { %4275 = vmatprep.subr.bf16.mxu0 %v5793_v33  ;;  %4357 = vmatprep.subr.bf16.mxu1 %v5796_v46  ;;  %v5856_v33 = vld [vmem:[%s7955_s10 + $0x3c4] ss:$28 sps:$4 sm:$0xff]  }
 0x3b9   : > { %4276 = vmatpush1.bf16.msra.mxu0 %v5791_v47  ;;  %4358 = vmatpush1.bf16.msra.mxu1 %v5794_v50  ;;  %v5851_v47 = vld [vmem:[%s7955_s10 + $0x3b8] ss:$28 sps:$4 sm:$0xff]   ;;  %v5854_v50 = vld [vmem:[%s7955_s10 + $0x3c0] ss:$28 sps:$4 sm:$0xff]  }
 0x3ba   : > { %4277 = vmatprep.subr.bf16.mxu0 %v5799_v11  ;;  %4359 = vmatprep.subr.bf16.mxu1 %v5802_v51  ;;  %v5859_v11 = vld [vmem:[%s7955_s10 + $0x3f4] ss:$28 sps:$4 sm:$0xff]   ;;  %v5862_v51 = vld [vmem:[%s7955_s10 + $0x3fc] ss:$28 sps:$4 sm:$0xff]  }
 0x3bd   : > { %4278 = vmatpush1.bf16.msra.mxu0 %v5797_v34  ;;  %4360 = vmatpush1.bf16.msra.mxu1 %v5800_v52  ;;  %v5857_v34 = vld [vmem:[%s7955_s10 + $0x3f0] ss:$28 sps:$4 sm:$0xff]   ;;  %v5860_v52 = vld [vmem:[%s7955_s10 + $0x3f8] ss:$28 sps:$4 sm:$0xff]  }
 0x3be   : > { %4279 = vmatprep.subr.bf16.mxu0 %v5805_v54  ;;  %4361 = vmatprep.subr.bf16.mxu1 %v5808_v56  ;;  %v5865_v54 = vld [vmem:[%s7955_s10 + $0x42c] ss:$28 sps:$4 sm:$0xff]   ;;  %v5868_v56 = vld [vmem:[%s7955_s10 + $0x434] ss:$28 sps:$4 sm:$0xff]  }
 0x3c1   : > { %4280 = vmatpush1.bf16.msra.mxu0 %v5803_v57  ;;  %4362 = vmatpush1.bf16.msra.mxu1 %v5806_v58  ;;  %v5863_v57 = vld [vmem:[%s7955_s10 + $0x428] ss:$28 sps:$4 sm:$0xff]   ;;  %v5866_v58 = vld [vmem:[%s7955_s10 + $0x430] ss:$28 sps:$4 sm:$0xff]  }
 0x3c2   : > { %4281 = vmatprep.subr.bf16.mxu0 %v5811_v45  ;;  %4363 = vmatprep.subr.bf16.mxu1 %v5814_v59  ;;  %v5871_v45 = vld [vmem:[%s7955_s10 + $0x464] ss:$28 sps:$4 sm:$0xff]   ;;  %v5874_v59 = vld [vmem:[%s7955_s10 + $0x46c] ss:$28 sps:$4 sm:$0xff]  }
 0x3c5   : > { %4282 = vmatpush1.bf16.msra.mxu0 %v5809_v60  ;;  %4364 = vmatpush1.bf16.msra.mxu1 %v5812_v61  ;;  %v5869_v60 = vld [vmem:[%s7955_s10 + $0x460] ss:$28 sps:$4 sm:$0xff]   ;;  %v5872_v61 = vld [vmem:[%s7955_s10 + $0x468] ss:$28 sps:$4 sm:$0xff]  }
 0x3c6   : > { %4283 = vmatprep.subr.bf16.mxu0 %v5817_v62  ;;  %4365 = vmatprep.subr.bf16.mxu1 %v5820_v63  ;;  %v5877_v62 = vld [vmem:[%s7955_s10 + $0x49c] ss:$28 sps:$4 sm:$0xff]   ;;  %v5880_v63 = vld [vmem:[%s7955_s10 + $0x4a4] ss:$28 sps:$4 sm:$0xff]  }
 0x3c9   : > { %4284 = vmatpush1.bf16.msra.mxu0 %v5815_v0  ;;  %4366 = vmatpush1.bf16.msra.mxu1 %v5818_v1  ;;  %v5875_v0 = vld [vmem:[%s7955_s10 + $0x498] ss:$28 sps:$4 sm:$0xff]   ;;  %v5878_v1 = vld [vmem:[%s7955_s10 + $0x4a0] ss:$28 sps:$4 sm:$0xff]  }
 0x3ca   : > { %4285 = vmatprep.subr.bf16.mxu0 %v5823_v42  ;;  %4367 = vmatprep.subr.bf16.mxu1 %v5826_v3  ;;  %v5883_v42 = vld [vmem:[%s7955_s10 + $0x4d4] ss:$28 sps:$4 sm:$0xff]   ;;  %v5886_v3 = vld [vmem:[%s7955_s10 + $0x4dc] ss:$28 sps:$4 sm:$0xff]  }
 0x3cd   : > { %4286 = vmatpush1.bf16.msra.mxu0 %v5821_v41  ;;  %4368 = vmatpush1.bf16.msra.mxu1 %v5824_v4  ;;  %v5881_v41 = vld [vmem:[%s7955_s10 + $0x4d0] ss:$28 sps:$4 sm:$0xff]   ;;  %v5884_v4 = vld [vmem:[%s7955_s10 + $0x4d8] ss:$28 sps:$4 sm:$0xff]  }
 0x3ce   : > { %4287 = vmatprep.subr.bf16.mxu0 %v5829_v49  ;;  %4369 = vmatprep.subr.bf16.mxu1 %v5832_v48  ;;  %v5889_v49 = vld [vmem:[%s7955_s10 + $0x50c] ss:$28 sps:$4 sm:$0xff]   ;;  %v5892_v48 = vld [vmem:[%s7955_s10 + $0x514] ss:$28 sps:$4 sm:$0xff]  }
 0x3d1   : > { %4288 = vmatpush1.bf16.msra.mxu0 %v5827_v5  ;;  %4370 = vmatpush1.bf16.msra.mxu1 %v5830_v2  ;;  %v5887_v5 = vld [vmem:[%s7955_s10 + $0x508] ss:$28 sps:$4 sm:$0xff]   ;;  %v5890_v2 = vld [vmem:[%s7955_s10 + $0x510] ss:$28 sps:$4 sm:$0xff]  }
 0x3d2   : > { %4289 = vmatprep.subr.bf16.mxu0 %v5835_v9  ;;  %4371 = vmatprep.subr.bf16.mxu1 %v5838_v10  ;;  %v5895_v9 = vld [vmem:[%s7955_s10 + $0x544] ss:$28 sps:$4 sm:$0xff]   ;;  %v5898_v10 = vld [vmem:[%s7955_s10 + $0x54c] ss:$28 sps:$4 sm:$0xff]  }
 0x3d5   : > { %4290 = vmatpush1.bf16.msra.mxu0 %v5833_v12  ;;  %4372 = vmatpush1.bf16.msra.mxu1 %v5836_v13  ;;  %v5893_v12 = vld [vmem:[%s7955_s10 + $0x540] ss:$28 sps:$4 sm:$0xff]   ;;  %v5896_v13 = vld [vmem:[%s7955_s10 + $0x548] ss:$28 sps:$4 sm:$0xff]  }
 0x3d6   : > { %4291 = vmatprep.subr.bf16.mxu0 %v5841_v55  ;;  %4373 = vmatprep.subr.bf16.mxu1 %v5844_v22  ;;  %v5901_v55 = vld [vmem:[%s7955_s10 + $0x57c] ss:$28 sps:$4 sm:$0xff]   ;;  %v5904_v22 = vld [vmem:[%s7955_s10 + $0x584] ss:$28 sps:$4 sm:$0xff]  }
 0x3d9   : > { %4292 = vmatpush1.bf16.msra.mxu0 %v5839_v53  ;;  %4374 = vmatpush1.bf16.msra.mxu1 %v5842_v14  ;;  %v5899_v53 = vld [vmem:[%s7955_s10 + $0x578] ss:$28 sps:$4 sm:$0xff]   ;;  %v5902_v14 = vld [vmem:[%s7955_s10 + $0x580] ss:$28 sps:$4 sm:$0xff]  }
 0x3da   : > { %4302 = vmatprep.subr.bf16.mxu0 %v5847_v15  ;;  %4384 = vmatprep.subr.bf16.mxu1 %v5850_v16  ;;  %v5907_v15 = vld [vmem:[%s7955_s10 + $0x5b4] ss:$28 sps:$4 sm:$0xff]   ;;  %v5910_v16 = vld [vmem:[%s7955_s10 + $0x5bc] ss:$28 sps:$4 sm:$0xff]  }
 0x46f   : > { %v2706_v27 = vpop.f32.mrb[2].mxu0  ;;  %v2777_v28 = vpop.f32.mrb[2].mxu1 }
 0x470   : > { %v2804_v29 = vadd.f32 %v2787_v18, %v2706_v27  ;;  %v7408_v31 = vadd.f32 %v2795_v23, %v2777_v28  ;;  %v2708_v30 = vpop.f32.mrb[3].mxu0  ;;  %v2779_v32 = vpop.f32.mrb[3].mxu1  ;;  %v5908_v18 = vld [vmem:[%s7955_s10 + $0x5b8] ss:$28 sps:$4 sm:$0xff]   ;;  %v5913_v23 = vld [vmem:[%s7955_s10 + $0x5ec] ss:$28 sps:$4 sm:$0xff]  }
 0x471   : > { %v2805_v35 = vadd.f32 %v2791_v25, %v2708_v30  ;;  %v2807_v36 = vadd.f32 %v2799_v26, %v2779_v32  ;;  %v5916_v25 = vld [vmem:[%s7955_s10 + $0x5f4] ss:$28 sps:$4 sm:$0xff]   ;;  %v5911_v26 = vld [vmem:[%s7955_s10 + $0x5e8] ss:$28 sps:$4 sm:$0xff]   ;;  %v5917_v30 = vld [vmem:[%s7955_s10 + $0x620] ss:$28 sps:$4 sm:$0xff]  }
 0x472   : > { %v2808_v37 = vmax.f32 %v2804_v29, 0.0  ;;  %v5914_v27 = vld [vmem:[%s7955_s10 + $0x5f0] ss:$28 sps:$4 sm:$0xff]   ;;  %v5919_v28 = vld [vmem:[%s7955_s10 + $0x624] ss:$28 sps:$4 sm:$0xff]  }
 0x473   : > { %v2809_v38 = vmax.f32 %v2805_v35, 0.0  ;;  %v2811_v39 = vmax.f32 %v2807_v36, 0.0  ;;  %v5922_v29 = vld [vmem:[%s7955_s10 + $0x62c] ss:$28 sps:$4 sm:$0xff]   ;;  %v5925_v35 = vld [vmem:[%s7955_s10 + $0x65c] ss:$28 sps:$4 sm:$0xff]  }
 0x474   : > { %v7418_v44 = vpack.c.bf16 %v2808_v37, %v2808_v37  ;;  %v5920_v32 = vld [vmem:[%s7955_s10 + $0x628] ss:$28 sps:$4 sm:$0xff]   ;;  %v5923_v37 = vld [vmem:[%s7955_s10 + $0x658] ss:$28 sps:$4 sm:$0xff]  }
 0x475   : > { %v7410_v19 = vpack.c.bf16 %v2809_v38, %v2809_v38  ;;  %v7428_v46 = vpack.c.bf16 %v2811_v39, %v2811_v39  ;;  %v5928_v36 = vld [vmem:[%s7955_s10 + $0x664] ss:$28 sps:$4 sm:$0xff]   ;;  %v5931_v39 = vld [vmem:[%s7955_s10 + $0x694] ss:$28 sps:$4 sm:$0xff]  }
 0x476   : > { %v5926_v38 = vld [vmem:[%s7955_s10 + $0x660] ss:$28 sps:$4 sm:$0xff]  }
 0x477   : > { %4293 = vmatprep.mubr.bf16.mxu0 %v7410_v19  ;;  %4375 = vmatprep.mubr.bf16.mxu1 %v7410_v19 }
 0x478   : > { %4294 = vmatmul.mubr.bf16.vlgmr.msra.gmra.mrb[20].mxu0 %v7418_v44  ;;  %4376 = vmatmul.mubr.bf16.vlgmr.msra.gmra.mrb[24].mxu1 %v7418_v44 }
 0x479   : > { %4303 = vmatpush1.bf16.msra.mxu0 %v5845_v40  ;;  %4385 = vmatpush1.bf16.msra.mxu1 %v5848_v43  ;;  %v5934_v40 = vld [vmem:[%s7955_s10 + $0x69c] ss:$28 sps:$4 sm:$0xff]   ;;  %v5929_v43 = vld [vmem:[%s7955_s10 + $0x690] ss:$28 sps:$4 sm:$0xff]  }
 0x47a   : > { %4334 = vmatprep.mubr.bf16.mxu0 %v7428_v46  ;;  %4416 = vmatprep.mubr.bf16.mxu1 %v7428_v46 }
 0x47b   : > { %4304 = vmatprep.subr.bf16.mxu0 %v5853_v24  ;;  %4386 = vmatprep.subr.bf16.mxu1 %v5856_v33  ;;  %v5932_v24 = vld [vmem:[%s7955_s10 + $0x698] ss:$28 sps:$4 sm:$0xff]   ;;  %v5937_v33 = vld [vmem:[%s7955_s10 + $0x6cc] ss:$28 sps:$4 sm:$0xff]  }
 0x47d   : > { %4305 = vmatpush1.bf16.msra.mxu0 %v5851_v47  ;;  %4387 = vmatpush1.bf16.msra.mxu1 %v5854_v50  ;;  %v5940_v47 = vld [vmem:[%s7955_s10 + $0x6d4] ss:$28 sps:$4 sm:$0xff]   ;;  %v5935_v50 = vld [vmem:[%s7955_s10 + $0x6c8] ss:$28 sps:$4 sm:$0xff]  }
 0x47e   : > { %4306 = vmatprep.subr.bf16.mxu0 %v5859_v11  ;;  %4388 = vmatprep.subr.bf16.mxu1 %v5862_v51  ;;  %v5938_v11 = vld [vmem:[%s7955_s10 + $0x6d0] ss:$28 sps:$4 sm:$0xff]   ;;  %v2810_v51 = vmax.f32 %v7408_v31, 0.0  ;;  %v5945_v31 = vld [vmem:[%s7955_s10 + $0x18] ss:$28 sps:$4 sm:$0xff]  }
 0x481   : > { %4307 = vmatpush1.bf16.msra.mxu0 %v5857_v34  ;;  %4389 = vmatpush1.bf16.msra.mxu1 %v5860_v52  ;;  %v5943_v34 = vld [vmem:[%s7955_s10 + $0x14] ss:$28 sps:$4 sm:$0xff]  }
 0x482   : > { %4308 = vmatprep.subr.bf16.mxu0 %v5865_v54  ;;  %4390 = vmatprep.subr.bf16.mxu1 %v5868_v56  ;;  %v5944_v52 = vld [vmem:[%s7955_s10 + $0x1d8] ss:$28 sps:$4 sm:$0xff]   ;;  %v5941_v54 = vld [vmem:[%s7955_s10 + $0x10] ss:$28 sps:$4 sm:$0xff]   ;;  %v7618_v56 = vpack.c.bf16 %v2810_v51, %v2810_v51 }
 0x483   : > { %v6010_v51 = vld [vmem:[%s7955_s10 + $0x4b0] ss:$28 sps:$4 sm:$0xff]  }
 0x485   : > { %4309 = vmatpush1.bf16.msra.mxu0 %v5863_v57  ;;  %4391 = vmatpush1.bf16.msra.mxu1 %v5866_v58  ;;  %v5948_v57 = vld [vmem:[%s7955_s10 + $0x4c] ss:$28 sps:$4 sm:$0xff]  }
 0x486   : > { %4310 = vmatprep.subr.bf16.mxu0 %v5871_v45  ;;  %4392 = vmatprep.subr.bf16.mxu1 %v5874_v59  ;;  %v5949_v58 = vld [vmem:[%s7955_s10 + $0x210] ss:$28 sps:$4 sm:$0xff]   ;;  %v5946_v45 = vld [vmem:[%s7955_s10 + $0x48] ss:$28 sps:$4 sm:$0xff]  }
 0x487   : > { %v5950_v59 = vld [vmem:[%s7955_s10 + $0x50] ss:$28 sps:$4 sm:$0xff]  }
 0x489   : > { %4311 = vmatpush1.bf16.msra.mxu0 %v5869_v60  ;;  %4393 = vmatpush1.bf16.msra.mxu1 %v5872_v61  ;;  %v5953_v60 = vld [vmem:[%s7955_s10 + $0x84] ss:$28 sps:$4 sm:$0xff]  }
 0x48a   : > { %4312 = vmatprep.subr.bf16.mxu0 %v5877_v62  ;;  %4394 = vmatprep.subr.bf16.mxu1 %v5880_v63  ;;  %v5954_v61 = vld [vmem:[%s7955_s10 + $0x248] ss:$28 sps:$4 sm:$0xff]   ;;  %v5951_v62 = vld [vmem:[%s7955_s10 + $0x80] ss:$28 sps:$4 sm:$0xff]  }
 0x48b   : > { %v5958_v63 = vld [vmem:[%s7955_s10 + $0xbc] ss:$28 sps:$4 sm:$0xff]  }
 0x48d   : > { %4313 = vmatpush1.bf16.msra.mxu0 %v5875_v0  ;;  %4395 = vmatpush1.bf16.msra.mxu1 %v5878_v1  ;;  %v5959_v0 = vld [vmem:[%s7955_s10 + $0x280] ss:$28 sps:$4 sm:$0xff]   ;;  %v5956_v1 = vld [vmem:[%s7955_s10 + $0xb8] ss:$28 sps:$4 sm:$0xff]  }
 0x48e   : > { %4314 = vmatprep.subr.bf16.mxu0 %v5883_v42  ;;  %4396 = vmatprep.subr.bf16.mxu1 %v5886_v3  ;;  %v5960_v42 = vld [vmem:[%s7955_s10 + $0xc0] ss:$28 sps:$4 sm:$0xff]   ;;  %v5963_v3 = vld [vmem:[%s7955_s10 + $0xf4] ss:$28 sps:$4 sm:$0xff]  }
 0x491   : > { %4315 = vmatpush1.bf16.msra.mxu0 %v5881_v41  ;;  %4397 = vmatpush1.bf16.msra.mxu1 %v5884_v4  ;;  %v5964_v41 = vld [vmem:[%s7955_s10 + $0x2b8] ss:$28 sps:$4 sm:$0xff]   ;;  %v5961_v4 = vld [vmem:[%s7955_s10 + $0xf0] ss:$28 sps:$4 sm:$0xff]  }
 0x492   : > { %4316 = vmatprep.subr.bf16.mxu0 %v5889_v49  ;;  %4398 = vmatprep.subr.bf16.mxu1 %v5892_v48  ;;  %v5965_v49 = vld [vmem:[%s7955_s10 + $0xf8] ss:$28 sps:$4 sm:$0xff]   ;;  %v5968_v48 = vld [vmem:[%s7955_s10 + $0x12c] ss:$28 sps:$4 sm:$0xff]  }
 0x495   : > { %4317 = vmatpush1.bf16.msra.mxu0 %v5887_v5  ;;  %4399 = vmatpush1.bf16.msra.mxu1 %v5890_v2  ;;  %v5969_v5 = vld [vmem:[%s7955_s10 + $0x2f0] ss:$28 sps:$4 sm:$0xff]   ;;  %v5966_v2 = vld [vmem:[%s7955_s10 + $0x128] ss:$28 sps:$4 sm:$0xff]  }
 0x496   : > { %4318 = vmatprep.subr.bf16.mxu0 %v5895_v9  ;;  %4400 = vmatprep.subr.bf16.mxu1 %v5898_v10  ;;  %v5970_v9 = vld [vmem:[%s7955_s10 + $0x130] ss:$28 sps:$4 sm:$0xff]   ;;  %v5973_v10 = vld [vmem:[%s7955_s10 + $0x164] ss:$28 sps:$4 sm:$0xff]  }
 0x499   : > { %4319 = vmatpush1.bf16.msra.mxu0 %v5893_v12  ;;  %4401 = vmatpush1.bf16.msra.mxu1 %v5896_v13  ;;  %v5974_v12 = vld [vmem:[%s7955_s10 + $0x328] ss:$28 sps:$4 sm:$0xff]   ;;  %v5971_v13 = vld [vmem:[%s7955_s10 + $0x160] ss:$28 sps:$4 sm:$0xff]  }
 0x49a   : > { %4320 = vmatprep.subr.bf16.mxu0 %v5901_v55  ;;  %4402 = vmatprep.subr.bf16.mxu1 %v5904_v22  ;;  %v5975_v55 = vld [vmem:[%s7955_s10 + $0x168] ss:$28 sps:$4 sm:$0xff]   ;;  %v5978_v22 = vld [vmem:[%s7955_s10 + $0x19c] ss:$28 sps:$4 sm:$0xff]  }
 0x49d   : > { %4321 = vmatpush1.bf16.msra.mxu0 %v5899_v53  ;;  %4403 = vmatpush1.bf16.msra.mxu1 %v5902_v14  ;;  %v5979_v53 = vld [vmem:[%s7955_s10 + $0x360] ss:$28 sps:$4 sm:$0xff]   ;;  %v5976_v14 = vld [vmem:[%s7955_s10 + $0x198] ss:$28 sps:$4 sm:$0xff]  }
 0x49e   : > { %4322 = vmatprep.subr.bf16.mxu0 %v5907_v15  ;;  %4404 = vmatprep.subr.bf16.mxu1 %v5910_v16  ;;  %v5980_v15 = vld [vmem:[%s7955_s10 + $0x1a0] ss:$28 sps:$4 sm:$0xff]   ;;  %v5983_v16 = vld [vmem:[%s7955_s10 + $0x1d4] ss:$28 sps:$4 sm:$0xff]  }
 0x4a1   : > { %4323 = vmatpush1.bf16.msra.mxu0 %v5905_v17  ;;  %4405 = vmatpush1.bf16.msra.mxu1 %v5908_v18  ;;  %v5984_v17 = vld [vmem:[%s7955_s10 + $0x558] ss:$28 sps:$4 sm:$0xff]   ;;  %v5981_v18 = vld [vmem:[%s7955_s10 + $0x1d0] ss:$28 sps:$4 sm:$0xff]  }
 0x4a2   : > { %4324 = vmatprep.subr.bf16.mxu0 %v5913_v23  ;;  %4406 = vmatprep.subr.bf16.mxu1 %v5916_v25  ;;  %v5985_v23 = vld [vmem:[%s7955_s10 + $0x398] ss:$28 sps:$4 sm:$0xff]   ;;  %v5988_v25 = vld [vmem:[%s7955_s10 + $0x20c] ss:$28 sps:$4 sm:$0xff]  }
 0x4a5   : > { %4325 = vmatpush1.bf16.msra.mxu0 %v5911_v26  ;;  %4407 = vmatpush1.bf16.msra.mxu1 %v5914_v27  ;;  %v5989_v26 = vld [vmem:[%s7955_s10 + $0x590] ss:$28 sps:$4 sm:$0xff]   ;;  %v5986_v27 = vld [vmem:[%s7955_s10 + $0x208] ss:$28 sps:$4 sm:$0xff]  }
 0x4a6   : > { %4326 = vmatprep.subr.bf16.mxu0 %v5919_v28  ;;  %4408 = vmatprep.subr.bf16.mxu1 %v5922_v29  ;;  %v5990_v28 = vld [vmem:[%s7955_s10 + $0x3d0] ss:$28 sps:$4 sm:$0xff]   ;;  %v5993_v29 = vld [vmem:[%s7955_s10 + $0x244] ss:$28 sps:$4 sm:$0xff]  }
 0x4a9   : > { %4327 = vmatpush1.bf16.msra.mxu0 %v5917_v30  ;;  %4409 = vmatpush1.bf16.msra.mxu1 %v5920_v32  ;;  %v5994_v30 = vld [vmem:[%s7955_s10 + $0x5c8] ss:$28 sps:$4 sm:$0xff]   ;;  %v5991_v32 = vld [vmem:[%s7955_s10 + $0x240] ss:$28 sps:$4 sm:$0xff]  }
 0x4aa   : > { %4328 = vmatprep.subr.bf16.mxu0 %v5925_v35  ;;  %4410 = vmatprep.subr.bf16.mxu1 %v5928_v36  ;;  %v5995_v35 = vld [vmem:[%s7955_s10 + $0x408] ss:$28 sps:$4 sm:$0xff]   ;;  %v5998_v36 = vld [vmem:[%s7955_s10 + $0x27c] ss:$28 sps:$4 sm:$0xff]  }
 0x4ad   : > { %4329 = vmatpush1.bf16.msra.mxu0 %v5923_v37  ;;  %4411 = vmatpush1.bf16.msra.mxu1 %v5926_v38  ;;  %v5999_v37 = vld [vmem:[%s7955_s10 + $0x600] ss:$28 sps:$4 sm:$0xff]   ;;  %v5996_v38 = vld [vmem:[%s7955_s10 + $0x278] ss:$28 sps:$4 sm:$0xff]  }
 0x4ae   : > { %4330 = vmatprep.subr.bf16.mxu0 %v5931_v39  ;;  %4412 = vmatprep.subr.bf16.mxu1 %v5934_v40  ;;  %v6000_v39 = vld [vmem:[%s7955_s10 + $0x440] ss:$28 sps:$4 sm:$0xff]   ;;  %v6003_v40 = vld [vmem:[%s7955_s10 + $0x2b4] ss:$28 sps:$4 sm:$0xff]  }
 0x4b1   : > { %4331 = vmatpush1.bf16.msra.mxu0 %v5929_v43  ;;  %4413 = vmatpush1.bf16.msra.mxu1 %v5932_v24  ;;  %v6004_v43 = vld [vmem:[%s7955_s10 + $0x638] ss:$28 sps:$4 sm:$0xff]   ;;  %v6001_v24 = vld [vmem:[%s7955_s10 + $0x2b0] ss:$28 sps:$4 sm:$0xff]  }
 0x4b2   : > { %4332 = vmatprep.subr.bf16.mxu0 %v5937_v33  ;;  %4414 = vmatprep.subr.bf16.mxu1 %v5940_v47  ;;  %v6005_v33 = vld [vmem:[%s7955_s10 + $0x478] ss:$28 sps:$4 sm:$0xff]   ;;  %v6008_v47 = vld [vmem:[%s7955_s10 + $0x2ec] ss:$28 sps:$4 sm:$0xff]  }
 0x4b5   : > { %4333 = vmatpush1.bf16.msra.mxu0 %v5935_v50  ;;  %4415 = vmatpush1.bf16.msra.mxu1 %v5938_v11  ;;  %v6009_v50 = vld [vmem:[%s7955_s10 + $0x670] ss:$28 sps:$4 sm:$0xff]   ;;  %v6006_v11 = vld [vmem:[%s7955_s10 + $0x2e8] ss:$28 sps:$4 sm:$0xff]  }
 0x4b6   : > { %4425 = vmatprep.subr.bf16.mxu0 %v5943_v34  ;;  %5271 = vmatprep.subr.bf16.mxu1 %v5944_v52  ;;  %v6013_v34 = vld [vmem:[%s7955_s10 + $0x324] ss:$28 sps:$4 sm:$0xff]  }
 0x4b7   : > { %v6014_v52 = vld [vmem:[%s7955_s10 + $0x6a8] ss:$28 sps:$4 sm:$0xff]  }
 0x4b8   : > { %4335 = vmatmul.mubr.bf16.vlgmr.msra.gmra.mrb[20].mxu0 %v7618_v56  ;;  %4417 = vmatmul.mubr.bf16.vlgmr.msra.gmra.mrb[24].mxu1 %v7618_v56 }
 0x4b9   : > { %4426 = vmatpush1.bf16.msra.mxu0 %v5941_v54  ;;  %4457 = vmatprep.mubr.bf16.mxu0 %v7410_v19  ;;  %v6011_v54 = vld [vmem:[%s7955_s10 + $0x320] ss:$28 sps:$4 sm:$0xff]  }
 0x4ba   : > { %5272 = vmatpush3.bf16.msra.mxu1 %v5945_v31  ;;  %4539 = vmatprep.mubr.bf16.mxu1 %v7410_v19  ;;  %v5955_v19 = vld [vmem:[%s7955_s10 + $0x88] ss:$28 sps:$4 sm:$0xff]  }
 0x4bb   : > { %4427 = vmatprep.subr.bf16.mxu0 %v5948_v57  ;;  %5273 = vmatprep.subr.bf16.mxu1 %v5949_v58  ;;  %v6015_v31 = vld [vmem:[%s7955_s10 + $0x4e8] ss:$28 sps:$4 sm:$0xff]   ;;  %v6018_v57 = vld [vmem:[%s7955_s10 + $0x35c] ss:$28 sps:$4 sm:$0xff]  }
 0x4bc   : > { %v6019_v58 = vld [vmem:[%s7955_s10 + $0x6e0] ss:$28 sps:$4 sm:$0xff]  }
 0x4bd   : > { %4428 = vmatpush1.bf16.msra.mxu0 %v5946_v45  ;;  %v6016_v45 = vld [vmem:[%s7955_s10 + $0x358] ss:$28 sps:$4 sm:$0xff]  }
 0x4be   : > { %5274 = vmatpush3.bf16.msra.mxu1 %v5950_v59  ;;  %4429 = vmatprep.subr.bf16.mxu0 %v5953_v60  ;;  %v6020_v59 = vld [vmem:[%s7955_s10 + $0x520] ss:$28 sps:$4 sm:$0xff]   ;;  %v6023_v60 = vld [vmem:[%s7955_s10 + $0x394] ss:$28 sps:$4 sm:$0xff]  }
 0x4bf   : > { %5275 = vmatprep.subr.bf16.mxu1 %v5954_v61  ;;  %v6021_v61 = vld [vmem:[%s7955_s10 + $0x390] ss:$28 sps:$4 sm:$0xff]  }
 0x4c1   : > { %4430 = vmatpush1.bf16.msra.mxu0 %v5951_v62  ;;  %v6026_v62 = vld [vmem:[%s7955_s10 + $0x3cc] ss:$28 sps:$4 sm:$0xff]  }
 0x4c2   : > { %5276 = vmatpush3.bf16.msra.mxu1 %v5955_v19  ;;  %4431 = vmatprep.subr.bf16.mxu0 %v5958_v63  ;;  %v6024_v19 = vld [vmem:[%s7955_s10 + $0x3c8] ss:$28 sps:$4 sm:$0xff]  }
 0x4c3   : > { %5277 = vmatprep.subr.bf16.mxu1 %v5959_v0  ;;  %v6029_v63 = vld [vmem:[%s7955_s10 + $0x404] ss:$28 sps:$4 sm:$0xff]  }
 0x4c4   : > { %v6027_v0 = vld [vmem:[%s7955_s10 + $0x400] ss:$28 sps:$4 sm:$0xff]  }
 0x4c5   : > { %4432 = vmatpush1.bf16.msra.mxu0 %v5956_v1  ;;  %v6035_v1 = vld [vmem:[%s7955_s10 + $0x474] ss:$28 sps:$4 sm:$0xff]  }
 0x4c6   : > { %5278 = vmatpush3.bf16.msra.mxu1 %v5960_v42  ;;  %4433 = vmatprep.subr.bf16.mxu0 %v5963_v3  ;;  %v6033_v42 = vld [vmem:[%s7955_s10 + $0x470] ss:$28 sps:$4 sm:$0xff]  }
 0x4c7   : > { %5279 = vmatprep.subr.bf16.mxu1 %v5964_v41  ;;  %v6038_v3 = vld [vmem:[%s7955_s10 + $0x4ac] ss:$28 sps:$4 sm:$0xff]  }
 0x4c8   : > { %v6036_v41 = vld [vmem:[%s7955_s10 + $0x4a8] ss:$28 sps:$4 sm:$0xff]  }
 0x4c9   : > { %4434 = vmatpush1.bf16.msra.mxu0 %v5961_v4  ;;  %v6041_v4 = vld [vmem:[%s7955_s10 + $0x4e4] ss:$28 sps:$4 sm:$0xff]  }
 0x4ca   : > { %5280 = vmatpush3.bf16.msra.mxu1 %v5965_v49  ;;  %4435 = vmatprep.subr.bf16.mxu0 %v5968_v48  ;;  %v6039_v49 = vld [vmem:[%s7955_s10 + $0x4e0] ss:$28 sps:$4 sm:$0xff]  }
 0x4cb   : > { %5281 = vmatprep.subr.bf16.mxu1 %v5969_v5  ;;  %v6044_v48 = vld [vmem:[%s7955_s10 + $0x51c] ss:$28 sps:$4 sm:$0xff]  }
 0x4cc   : > { %v6042_v5 = vld [vmem:[%s7955_s10 + $0x518] ss:$28 sps:$4 sm:$0xff]  }
 0x4cd   : > { %4436 = vmatpush1.bf16.msra.mxu0 %v5966_v2  ;;  %v6047_v2 = vld [vmem:[%s7955_s10 + $0x554] ss:$28 sps:$4 sm:$0xff]  }
 0x4ce   : > { %5282 = vmatpush3.bf16.msra.mxu1 %v5970_v9  ;;  %4437 = vmatprep.subr.bf16.mxu0 %v5973_v10  ;;  %v6045_v9 = vld [vmem:[%s7955_s10 + $0x550] ss:$28 sps:$4 sm:$0xff]  }
 0x4cf   : > { %5283 = vmatprep.subr.bf16.mxu1 %v5974_v12  ;;  %v6050_v10 = vld [vmem:[%s7955_s10 + $0x58c] ss:$28 sps:$4 sm:$0xff]  }
 0x4d0   : > { %v6048_v12 = vld [vmem:[%s7955_s10 + $0x588] ss:$28 sps:$4 sm:$0xff]  }
 0x4d1   : > { %4438 = vmatpush1.bf16.msra.mxu0 %v5971_v13  ;;  %v6053_v13 = vld [vmem:[%s7955_s10 + $0x5c4] ss:$28 sps:$4 sm:$0xff]  }
 0x4d2   : > { %5284 = vmatpush3.bf16.msra.mxu1 %v5975_v55  ;;  %4439 = vmatprep.subr.bf16.mxu0 %v5978_v22  ;;  %v6051_v55 = vld [vmem:[%s7955_s10 + $0x5c0] ss:$28 sps:$4 sm:$0xff]  }
 0x4d3   : > { %5285 = vmatprep.subr.bf16.mxu1 %v5979_v53  ;;  %v6056_v22 = vld [vmem:[%s7955_s10 + $0x5fc] ss:$28 sps:$4 sm:$0xff]  }
 0x4d4   : > { %v6054_v53 = vld [vmem:[%s7955_s10 + $0x5f8] ss:$28 sps:$4 sm:$0xff]  }
 0x4d5   : > { %4440 = vmatpush1.bf16.msra.mxu0 %v5976_v14  ;;  %v6059_v14 = vld [vmem:[%s7955_s10 + $0x634] ss:$28 sps:$4 sm:$0xff]  }
 0x4d6   : > { %5286 = vmatpush3.bf16.msra.mxu1 %v5980_v15  ;;  %4441 = vmatprep.subr.bf16.mxu0 %v5983_v16  ;;  %v6057_v15 = vld [vmem:[%s7955_s10 + $0x630] ss:$28 sps:$4 sm:$0xff]  }
 0x4d7   : > { %5293 = vmatprep.subr.bf16.mxu1 %v5984_v17  ;;  %v6062_v16 = vld [vmem:[%s7955_s10 + $0x66c] ss:$28 sps:$4 sm:$0xff]  }
 0x4d8   : > { %v6060_v17 = vld [vmem:[%s7955_s10 + $0x668] ss:$28 sps:$4 sm:$0xff]  }
 0x4d9   : > { %4540 = vmatmul.mubr.bf16.vlgmr.msra.gmra.mrb[28].mxu1 %v7418_v44  ;;  %4442 = vmatpush1.bf16.msra.mxu0 %v5981_v18  ;;  %v6065_v18 = vld [vmem:[%s7955_s10 + $0x6a4] ss:$28 sps:$4 sm:$0xff]  }
 0x4da   : > { %5294 = vmatpush3.bf16.msra.mxu1 %v5985_v23  ;;  %4579 = vmatprep.mubr.bf16.mxu1 %v7428_v46  ;;  %v6063_v23 = vld [vmem:[%s7955_s10 + $0x6a0] ss:$28 sps:$4 sm:$0xff]  }
 0x4db   : > { %4443 = vmatprep.subr.bf16.mxu0 %v5988_v25  ;;  %5295 = vmatprep.subr.bf16.mxu1 %v5989_v26  ;;  %v6068_v25 = vld [vmem:[%s7955_s10 + $0x6dc] ss:$28 sps:$4 sm:$0xff]  }
 0x4dc   : > { %v6066_v26 = vld [vmem:[%s7955_s10 + $0x6d8] ss:$28 sps:$4 sm:$0xff]  }
 0x4dd   : > { %4444 = vmatpush1.bf16.msra.mxu0 %v5986_v27  ;;  %v7912_v27 = vld [vmem:[%s7956_s11] sm:$0x7f] }
 0x4de   : > { %5296 = vmatpush3.bf16.msra.mxu1 %v5990_v28  ;;  %4445 = vmatprep.subr.bf16.mxu0 %v5993_v29  ;;  %v3077_v28 = vrot.slane %v7912_v27, %v7036_v7  ;;  %v3085_v29 = vrot.slane %v7912_v27, %v7146_v20 }
 0x4df   : > { %5297 = vmatprep.subr.bf16.mxu1 %v5994_v30  ;;  %v3081_v30 = vrot.slane %v7912_v27, %v7044_v8 }
 0x4e1   : > { %4446 = vmatpush1.bf16.msra.mxu0 %v5991_v32  ;;  %v3089_v32 = vrot.slane %v7912_v27, %v7149_v21 }
 0x4e2   : > { %5298 = vmatpush3.bf16.msra.mxu1 %v5995_v35  ;;  %4447 = vmatprep.subr.bf16.mxu0 %v5998_v36 }
 0x4e3   : > { %5299 = vmatprep.subr.bf16.mxu1 %v5999_v37 }
 0x4e5   : > { %4448 = vmatpush1.bf16.msra.mxu0 %v5996_v38 }
 0x4e6   : > { %5300 = vmatpush3.bf16.msra.mxu1 %v6000_v39  ;;  %4449 = vmatprep.subr.bf16.mxu0 %v6003_v40 }
 0x4e7   : > { %5301 = vmatprep.subr.bf16.mxu1 %v6004_v43 }
 0x4e9   : > { %4450 = vmatpush1.bf16.msra.mxu0 %v6001_v24 }
 0x4ea   : > { %5302 = vmatpush3.bf16.msra.mxu1 %v6005_v33  ;;  %4451 = vmatprep.subr.bf16.mxu0 %v6008_v47 }
 0x4eb   : > { %5303 = vmatprep.subr.bf16.mxu1 %v6009_v50 }
 0x4ed   : > { %4452 = vmatpush1.bf16.msra.mxu0 %v6006_v11 }
 0x4ee   : > { %5304 = vmatpush3.bf16.msra.mxu1 %v6010_v51  ;;  %4453 = vmatprep.subr.bf16.mxu0 %v6013_v34 }
 0x4ef   : > { %5305 = vmatprep.subr.bf16.mxu1 %v6014_v52 }
 0x4f1   : > { %4454 = vmatpush1.bf16.msra.mxu0 %v6011_v54 }
 0x4f2   : > { %5306 = vmatpush3.bf16.msra.mxu1 %v6015_v31  ;;  %4455 = vmatprep.subr.bf16.mxu0 %v6018_v57 }
 0x4f3   : > { %5307 = vmatprep.subr.bf16.mxu1 %v6019_v58 }
 0x4f5   : > { %4456 = vmatpush1.bf16.msra.mxu0 %v6016_v45 }
 0x4f6   : > { %5308 = vmatpush3.bf16.msra.mxu1 %v6020_v59  ;;  %4466 = vmatprep.subr.bf16.mxu0 %v6023_v60 }
 0x4f8   : > { %4458 = vmatmul.mubr.bf16.vlgmr.msra.gmra.mrb[24].mxu0 %v7418_v44  ;;  %v6032_v44 = vld [vmem:[%s7955_s10 + $0x43c] ss:$28 sps:$4 sm:$0xff]  }
 0x4f9   : > { %4580 = vmatmul.mubr.bf16.vlgmr.msra.gmra.mrb[32].mxu1 %v7618_v56  ;;  %4467 = vmatpush1.bf16.msra.mxu0 %v6021_v61 }
 0x4fa   : > { %4498 = vmatprep.mubr.bf16.mxu0 %v7428_v46  ;;  %4468 = vmatprep.subr.bf16.mxu0 %v6026_v62  ;;  %v6030_v46 = vld [vmem:[%s7955_s10 + $0x438] ss:$28 sps:$4 sm:$0xff]  }
 0x4fd   : > { %4469 = vmatpush1.bf16.msra.mxu0 %v6024_v19 }
 0x4fe   : > { %4470 = vmatprep.subr.bf16.mxu0 %v6029_v63 }
 0x501   : > { %4471 = vmatpush1.bf16.msra.mxu0 %v6027_v0 }
 0x502   : > { %4472 = vmatprep.subr.bf16.mxu0 %v6032_v44 }
 0x505   : > { %4473 = vmatpush1.bf16.msra.mxu0 %v6030_v46 }
 0x506   : > { %4474 = vmatprep.subr.bf16.mxu0 %v6035_v1 }
 0x509   : > { %4475 = vmatpush1.bf16.msra.mxu0 %v6033_v42 }
 0x50a   : > { %4476 = vmatprep.subr.bf16.mxu0 %v6038_v3 }
 0x50d   : > { %4477 = vmatpush1.bf16.msra.mxu0 %v6036_v41  ;;  %v3100_v41 = vsub.s32 6, %v7033_v6 }
 0x50e   : > { %4478 = vmatprep.subr.bf16.mxu0 %v6041_v4 }
 0x50f   : > { %v3101_v4 = vrot.slane %v7912_v27, %v3100_v41 }
 0x511   : > { %4479 = vmatpush1.bf16.msra.mxu0 %v6039_v49 }
 0x512   : > { %4480 = vmatprep.subr.bf16.mxu0 %v6044_v48 }
 0x515   : > { %4481 = vmatpush1.bf16.msra.mxu0 %v6042_v5 }
 0x516   : > { %4482 = vmatprep.subr.bf16.mxu0 %v6047_v2 }
 0x519   : > { %4483 = vmatpush1.bf16.msra.mxu0 %v6045_v9 }
 0x51a   : > { %4484 = vmatprep.subr.bf16.mxu0 %v6050_v10 }
 0x51d   : > { %4485 = vmatpush1.bf16.msra.mxu0 %v6048_v12 }
 0x51e   : > { %4486 = vmatprep.subr.bf16.mxu0 %v6053_v13 }
 0x521   : > { %4487 = vmatpush1.bf16.msra.mxu0 %v6051_v55 }
 0x522   : > { %4488 = vmatprep.subr.bf16.mxu0 %v6056_v22 }
 0x525   : > { %4489 = vmatpush1.bf16.msra.mxu0 %v6054_v53 }
 0x526   : > { %4490 = vmatprep.subr.bf16.mxu0 %v6059_v14 }
 0x529   : > { %4491 = vmatpush1.bf16.msra.mxu0 %v6057_v15  ;;  %v3092_v15 = vsub.s32 4, %v7033_v6 }
 0x52a   : > { %4492 = vmatprep.subr.bf16.mxu0 %v6062_v16  ;;  %v3096_v16 = vsub.s32 5, %v7033_v6 }
 0x52d   : > { %4493 = vmatpush1.bf16.msra.mxu0 %v6060_v17  ;;  %v3093_v17 = vrot.slane %v7912_v27, %v3092_v15 }
 0x52e   : > { %4494 = vmatprep.subr.bf16.mxu0 %v6065_v18  ;;  %v3097_v18 = vrot.slane %v7912_v27, %v3096_v16 }
 0x531   : > { %4495 = vmatpush1.bf16.msra.mxu0 %v6063_v23 }
 0x532   : > { %4496 = vmatprep.subr.bf16.mxu0 %v6068_v25 }
 0x535   : > { %4497 = vmatpush1.bf16.msra.mxu0 %v6066_v26 }
 0x538   : > { %4499 = vmatmul.mubr.bf16.vlgmr.msra.gmra.mrb[24].mxu0 %v7618_v56 }
 0x58b   : > { %v4336_v35 = vpop.f32.mrb[20].mxu0  ;;  %v4418_v36 = vpop.f32.mrb[24].mxu1 }
 0x58c   : > { %v5411_v56 = vadd.f32 %v4336_v35, %v3077_v28  ;;  %v5413_v37 = vadd.f32 %v4418_v36, %v3085_v29  ;;  %v4338_v38 = vpop.f32.mrb[21].mxu0  ;;  %v4420_v39 = vpop.f32.mrb[25].mxu1 }
 0x58d   : > { %v5412_v40 = vadd.f32 %v4338_v38, %v3081_v30  ;;  %v5414_v43 = vadd.f32 %v4420_v39, %v3089_v32  ;;  %v4340_v24 = vpop.f32.mrb[22].mxu0  ;;  %v4422_v33 = vpop.f32.mrb[26].mxu1 }
 0x58e   : > { %v4587_v7 = vsub.f32 0.0, %v5411_v56  ;;  %v4589_v47 = vsub.f32 0.0, %v5413_v37  ;;  %v4341_v50 = vpop.f32.mrb[23].mxu0  ;;  %v4423_v20 = vpop.f32.mrb[27].mxu1 }
 0x58f   : > { %v4588_v11 = vsub.f32 0.0, %v5412_v40  ;;  %v4590_v51 = vsub.f32 0.0, %v5414_v43 }
 0x590   : > { %v4594_v8 = vmul.f32 1.442695, %v4587_v7  ;;  %v4598_v34 = vmul.f32 1.442695, %v4589_v47 }
 0x591   : > { %v4596_v52 = vmul.f32 1.442695, %v4588_v11  ;;  %v4600_v21 = vmul.f32 1.442695, %v4590_v51 }
 0x592   : > { %6071 = vpow2.f32 %v4594_v8 }
 0x593   : > { %6073 = vpow2.f32 %v4598_v34 }
 0x594   : > { %6075 = vpow2.f32 %v4596_v52 }
 0x595   : > { %6077 = vpow2.f32 %v4600_v21 }
 0x59c   : > { %v6072_v54 = vpop.eup %6071 }
 0x59d   : > { %v6074_v31 = vpop.eup %6073  ;;  %v4608_v57 = vadd.f32 1.0, %v6072_v54 }
 0x59e   : > { %v6076_v58 = vpop.eup %6075  ;;  %v4610_v45 = vadd.f32 1.0, %v6074_v31 }
 0x59f   : > { %v6078_v59 = vpop.eup %6077  ;;  %6079 = vrcp.f32 %v4608_v57  ;;  %v4609_v60 = vadd.f32 1.0, %v6076_v58 }
 0x5a0   : > { %6081 = vrcp.f32 %v4610_v45  ;;  %v4611_v61 = vadd.f32 1.0, %v6078_v59 }
 0x5a1   : > { %6083 = vrcp.f32 %v4609_v60 }
 0x5a2   : > { %6085 = vrcp.f32 %v4611_v61 }
 0x5a9   : > { %v6080_v62 = vpop.eup %6079 }
 0x5aa   : > { %v6082_v19 = vpop.eup %6081  ;;  %4622 = vst [vmem:[%s7926_s18] sm:$0xff] %v6080_v62 }
 0x5ab   : > { %v6084_v63 = vpop.eup %6083  ;;  %4624 = vst [vmem:[%s7926_s18 + $0x10] sm:$0xff] %v6082_v19 }
 0x5ac   : > { %v6086_v0 = vpop.eup %6085  ;;  %4623 = vst [vmem:[%s7926_s18 + $0x8] sm:$0xff] %v6084_v63  ;;  %v5287_v44 = vpop.f32.mrb[28].mxu1 }
 0x5ad   : > { %4625 = vst [vmem:[%s7926_s18 + $0x18] sm:$0xff] %v6086_v0  ;;  %v5288_v46 = vpop.f32.mrb[29].mxu1 }
 0x5ae   : > { %v5289_v1 = vadd.f32 %v5288_v46, %v5287_v44  ;;  %v5290_v42 = vpop.f32.mrb[30].mxu1 }
 0x5af   : > { %v5291_v3 = vpop.f32.mrb[31].mxu1 }
 0x5b0   : > { %v4542_v5 = vadd.f32 %v5289_v1, %v3101_v4 }
 0x5cc   : > { %v5309_v49 = vpop.f32.mrb[32].mxu1 }
 0x5cd   : > { %v5310_v48 = vpop.f32.mrb[33].mxu1 }
 0x5ce   : > { %v5311_v2 = vadd.f32 %v5310_v48, %v5309_v49  ;;  %v5312_v9 = vpop.f32.mrb[34].mxu1 }
 0x5cf   : > { %v5313_v10 = vpop.f32.mrb[35].mxu1 }
 0x5d0   : > { %v4582_v12 = vadd.f32 %v5311_v2, %v4542_v5 }
 0x5d2   : > { %v4593_v13 = vsub.f32 0.0, %v4582_v12 }
 0x5d4   : > { %v4606_v55 = vmul.f32 1.442695, %v4593_v13 }
 0x5d6   : > { %6087 = vpow2.f32 %v4606_v55 }
 0x5e0   : > { %v6088_v22 = vpop.eup %6087 }
 0x5e1   : > { %v4614_v53 = vadd.f32 1.0, %v6088_v22 }
 0x5e3   : > { %6089 = vrcp.f32 %v4614_v53 }
 0x5ed   : > { %v6090_v14 = vpop.eup %6089 }
 0x5ee   : > { %4628 = vst.msk [vmem:[%s7926_s18 + $0x30] sm:$0xff] %vm2028_vm5, %v6090_v14 }
 0x60b   : > { %v4500_v23 = vpop.f32.mrb[24].mxu0 }
 0x60c   : > { %v5415_v25 = vadd.f32 %v4500_v23, %v3093_v17  ;;  %v4502_v26 = vpop.f32.mrb[25].mxu0 }
 0x60d   : > { %v5416_v28 = vadd.f32 %v4502_v26, %v3097_v18  ;;  %v4504_v29 = vpop.f32.mrb[26].mxu0 }
 0x60e   : > { %v4591_v30 = vsub.f32 0.0, %v5415_v25  ;;  %v4505_v32 = vpop.f32.mrb[27].mxu0 }
 0x60f   : > { %v4592_v35 = vsub.f32 0.0, %v5416_v28 }
 0x610   : > { %v4602_v36 = vmul.f32 1.442695, %v4591_v30 }
 0x611   : > { %v4604_v56 = vmul.f32 1.442695, %v4592_v35 }
 0x612   : > { %6091 = vpow2.f32 %v4602_v36 }
 0x613   : > { %6093 = vpow2.f32 %v4604_v56 }
 0x61c   : > { %v6092_v37 = vpop.eup %6091 }
 0x61d   : > { %v6094_v6 = vpop.eup %6093  ;;  %v4612_v38 = vadd.f32 1.0, %v6092_v37 }
 0x61e   : > { %v4613_v39 = vadd.f32 1.0, %v6094_v6 }
 0x61f   : > { %6095 = vrcp.f32 %v4612_v38 }
 0x620   : > { %6097 = vrcp.f32 %v4613_v39 }
 0x629   : > { %v6096_v27 = vpop.eup %6095 }
 0x62a   : > { %v6098_v40 = vpop.eup %6097  ;;  %4626 = vst [vmem:[%s7926_s18 + $0x20] sm:$0xff] %v6096_v27 }
 0x62b   : > { %4627 = vst [vmem:[%s7926_s18 + $0x28] sm:$0xff] %v6098_v40 }
 0x62c PF: > { %s24_s25 = sadd.s32 1, %s6105_s25  }
 0x62d   : > { %p21_p4 = scmp.ge.s32.totalorder %s24_s25, 4  }
 0x62f   :  { %23 = sbr.rel (!%p21_p4) target bundleno = 1 (0x1), region = 116 }

</bundles_post_ra>
